<compile_context>
chip_gen: v6e
topology: v6e:2x2x1
jax: 0.10.0
libtpu: 0.0.40
codegen_flags: <defaults>
</compile_context>

<pallas_src>
import math

import jax
import jax.numpy as jnp
import numpy as np
from jax.experimental import pallas as pl
from jax.experimental.pallas import tpu as pltpu

# ---------------- config ----------------
VOCAB = 256
HIDDEN = 128
N_LAYERS = 2
N_HEADS = 4
HEAD_DIM = HIDDEN // N_HEADS          # 32
INTERMEDIATE = 256
RMS_EPS = 1e-5
ROPE_THETA = 10000.0

BATCH = 2
SEQ = 8
BS = BATCH * SEQ                      # 16 tokens
HBS = N_HEADS * BS                    # 64 (head, key-token) lanes

_HP = jax.lax.Precision.HIGHEST       # used only in the pure-JAX reference / weight fold


# ---------------- fused forward kernel (single invocation, no grid) ----------------
def _fused_forward_kernel(
    x_emb_ref, cos_ref, sin_ref, bias_ref, vmask_ref, seg_ref,
    ln1_ref, wqkv_ref, wo_ref, ln2_ref, wgu_ref, wd_ref,
    fnorm_ref, lm_head_ref,
    logits_ref,
):
    f32 = jnp.float32
    bf16 = jnp.bfloat16

    x = x_emb_ref[...]        # [BS, H] residual stream (stays in vregs)
    cos = cos_ref[...]        # [BS, H]  f32
    sin = sin_ref[...]        # [BS, H]  f32
    bias = bias_ref[...]      # [BS, HBS] additive mask, tiled per head, f32
    vmask = vmask_ref[...]    # [HBS, H] block-diagonal head mask, f32
    seg = seg_ref[...]        # [HBS, HBS] per-head segment-sum matrix, bf16

    def rms(v, w):            # w: [1, H]
        var = jnp.mean(v * v, axis=-1, keepdims=True)
        return v * jax.lax.rsqrt(var + RMS_EPS) * w

    def mm(a, b):             # MXU matmul: bf16 operands, f32 accumulate (1 pass)
        return jnp.dot(a.astype(bf16), b.astype(bf16), preferred_element_type=f32)

    for l in range(N_LAYERS):             # static unroll (2 layers)
        # ---- attention: ln1 + fused QKV (rope & scale folded) + SDPA + wo ----
        h = rms(x, ln1_ref[l])
        qkv = mm(h, wqkv_ref[l])                                   # [BS, 5H]
        q = qkv[:, 0 * HIDDEN:1 * HIDDEN] * cos + qkv[:, 1 * HIDDEN:2 * HIDDEN] * sin
        k = qkv[:, 2 * HIDDEN:3 * HIDDEN] * cos + qkv[:, 3 * HIDDEN:4 * HIDDEN] * sin
        v = qkv[:, 4 * HIDDEN:5 * HIDDEN]

        # Block-diagonal head expansion: row h*BS+j holds token j's K/V restricted
        # to head h's 32 columns (zeros elsewhere), so one matmul does all heads.
        kb = jnp.concatenate([k] * N_HEADS, axis=0) * vmask        # [HBS, H]
        vb = jnp.concatenate([v] * N_HEADS, axis=0) * vmask        # [HBS, H]

        # All-head scores in one lane-dense slab: sc[i, h*BS+j] = q_h[i]·k_h[j]
        sc = jax.lax.dot_general(
            q.astype(bf16), kb.astype(bf16), (((1,), (1,)), ((), ())),
            preferred_element_type=f32) + bias                     # [BS, HBS]

        # Batched softmax: row max is constant per row, hence per segment -> valid shift.
        m = jnp.max(sc, axis=-1, keepdims=True)
        p = jnp.exp(sc - m)
        denom = mm(p, seg)                          # segmented sums, broadcast per lane
        probs = p * pl.reciprocal(denom, approx=True)
        attn = mm(probs, vb)                        # [BS, H] merged heads, lane-dense
        x = x + mm(attn, wo_ref[l])

        # ---- MLP: ln2 + fused gate|up + SwiGLU + down ----
        h2 = rms(x, ln2_ref[l])
        gu = mm(h2, wgu_ref[l])                     # [BS, 2I]
        g = gu[:, :INTERMEDIATE]
        u = gu[:, INTERMEDIATE:]
        x = x + mm((g * jax.nn.sigmoid(g)) * u, wd_ref[l])

    # ---- final RMSNorm + lm_head (lane-dense [BS, VOCAB]) ----
    xf = rms(x, fnorm_ref[...])
    logits_ref[...] = mm(xf, lm_head_ref[...])


# ---------------- static tables (numpy, folded at trace time) ----------------
def _rope_tables():
    inv_freq = 1.0 / (ROPE_THETA ** (np.arange(0, HEAD_DIM, 2, dtype=np.float32)
                                     / HEAD_DIM))
    pos = np.arange(SEQ, dtype=np.float32)
    freqs = np.outer(pos, inv_freq)                      # [S, D/2]
    emb = np.concatenate([freqs, freqs], axis=-1)        # [S, D]
    cos_h, sin_h = np.cos(emb), np.sin(emb)
    cos_bs = np.tile(np.tile(cos_h, (1, N_HEADS)), (BATCH, 1))   # [BS, H]
    sin_bs = np.tile(np.tile(sin_h, (1, N_HEADS)), (BATCH, 1))   # [BS, H]
    return jnp.asarray(cos_bs), jnp.asarray(sin_bs)


def _rope_perm():
    # x @ P == rotate_half(x) per head (entries are +/-1, exact).
    d2 = HEAD_DIM // 2
    p_head = np.zeros((HEAD_DIM, HEAD_DIM), np.float32)
    p_head[d2:, :d2] = -np.eye(d2, dtype=np.float32)     # out[:d2] = -x[d2:]
    p_head[:d2, d2:] = np.eye(d2, dtype=np.float32)      # out[d2:] =  x[:d2]
    p_full = np.zeros((HIDDEN, HIDDEN), np.float32)
    for h in range(N_HEADS):
        p_full[h * HEAD_DIM:(h + 1) * HEAD_DIM,
               h * HEAD_DIM:(h + 1) * HEAD_DIM] = p_head
    return jnp.asarray(p_full)


# ---------------- parameter init (raw, HF-like, f32) ----------------
def init_params(key):
    def normal(k, shape, scale=0.02):
        return scale * jax.random.normal(k, shape, dtype=jnp.float32)

    keys = jax.random.split(key, 2 + N_LAYERS * 7)
    embed = normal(keys[0], (VOCAB, HIDDEN))
    lm_head = normal(keys[1], (HIDDEN, VOCAB))

    wq, wk, wv, wo, wg, wu, wd = [], [], [], [], [], [], []
    for l in range(N_LAYERS):
        kk = keys[2 + l * 7: 2 + (l + 1) * 7]
        wq.append(normal(kk[0], (HIDDEN, HIDDEN)))
        wk.append(normal(kk[1], (HIDDEN, HIDDEN)))
        wv.append(normal(kk[2], (HIDDEN, HIDDEN)))
        wo.append(normal(kk[3], (HIDDEN, HIDDEN)))
        wg.append(normal(kk[4], (HIDDEN, INTERMEDIATE)))
        wu.append(normal(kk[5], (HIDDEN, INTERMEDIATE)))
        wd.append(normal(kk[6], (INTERMEDIATE, HIDDEN)))

    return {
        "embed": embed,
        "lm_head": lm_head,
        "final_norm": jnp.ones((1, HIDDEN), jnp.float32),
        "ln1": jnp.ones((N_LAYERS, 1, HIDDEN), jnp.float32),
        "ln2": jnp.ones((N_LAYERS, 1, HIDDEN), jnp.float32),
        "wq": jnp.stack(wq), "wk": jnp.stack(wk), "wv": jnp.stack(wv),
        "wo": jnp.stack(wo), "wg": jnp.stack(wg), "wu": jnp.stack(wu),
        "wd": jnp.stack(wd),
    }


# ---------------- kernel-ready weight packing ----------------
def pack_params(p):
    perm = _rope_perm()                                   # [H, H]
    scale = 1.0 / math.sqrt(HEAD_DIM)
    wq_s = p["wq"] * scale                                # fold score scale into Wq
    wq_rot = jnp.matmul(wq_s, perm, precision=_HP)        # exact signed permutation
    wk_rot = jnp.matmul(p["wk"], perm, precision=_HP)
    wqkv5 = jnp.concatenate([wq_s, wq_rot, p["wk"], wk_rot, p["wv"]], axis=-1)  # [L,H,5H]
    wgu = jnp.concatenate([p["wg"], p["wu"]], axis=-1)    # [L, H, 2I]

    cos, sin = _rope_tables()

    vmask = np.zeros((HBS, HIDDEN), np.float32)           # block-diag head mask
    seg = np.zeros((HBS, HBS), np.float32)                # per-head segment-sum matrix
    for h in range(N_HEADS):
        vmask[h * BS:(h + 1) * BS, h * HEAD_DIM:(h + 1) * HEAD_DIM] = 1.0
        seg[h * BS:(h + 1) * BS, h * BS:(h + 1) * BS] = 1.0

    return {
        "embed": p["embed"],
        "cos": cos, "sin": sin,
        "vmask": jnp.asarray(vmask),
        "seg": jnp.asarray(seg).astype(jnp.bfloat16),
        "ln1": p["ln1"], "ln2": p["ln2"], "final_norm": p["final_norm"],
        "wqkv": wqkv5.astype(jnp.bfloat16),               # MXU-only weights stored bf16
        "wo": p["wo"].astype(jnp.bfloat16),
        "wgu": wgu.astype(jnp.bfloat16),
        "wd": p["wd"].astype(jnp.bfloat16),
        "lm_head": p["lm_head"].astype(jnp.bfloat16),
    }


# ---------------- forward (single fused, ungridded pallas_call) ----------------
@jax.jit
def llm_forward(packed, input_ids, attention_mask):
    """Equivalent of LLMWrapper.forward(...).logits -> [B, S, VOCAB] f32."""
    # TODO(synk): embedding gather kept in plain JAX (data-dependent gather).
    x_emb = jnp.take(packed["embed"], input_ids.reshape(-1), axis=0)   # [BS, H]

    # causal ∧ same-batch ∧ key-valid additive bias, tiled per head -> [BS, HBS].
    tok_batch = jnp.repeat(jnp.arange(BATCH, dtype=jnp.int32), SEQ)
    idx = jnp.arange(BS, dtype=jnp.int32)
    same_b = tok_batch[:, None] == tok_batch[None, :]
    causal = idx[None, :] <= idx[:, None]
    key_ok = attention_mask.reshape(-1) > 0
    bias = jnp.where(same_b & causal & key_ok[None, :], 0.0, -1e9).astype(jnp.float32)
    bias_h = jnp.tile(bias, (1, N_HEADS))                               # [BS, HBS]

    vmem = pl.BlockSpec(memory_space=pltpu.MemorySpace.VMEM)
    logits = pl.pallas_call(
        _fused_forward_kernel,
        out_shape=jax.ShapeDtypeStruct((BS, VOCAB), jnp.float32),
        in_specs=[vmem] * 14,
        out_specs=vmem,
    )(x_emb, packed["cos"], packed["sin"], bias_h, packed["vmask"], packed["seg"],
      packed["ln1"], packed["wqkv"], packed["wo"], packed["ln2"],
      packed["wgu"], packed["wd"], packed["final_norm"], packed["lm_head"])

    return logits.reshape(BATCH, SEQ, VOCAB)


# ---------------- pure-JAX reference (f32, HIGHEST precision) ----------------
def _ref_forward(params, input_ids, attention_mask):
    B, S = input_ids.shape
    x = jnp.take(params["embed"], input_ids.reshape(-1), axis=0).reshape(B, S, HIDDEN)

    inv_freq = 1.0 / (ROPE_THETA ** (jnp.arange(0, HEAD_DIM, 2, dtype=jnp.float32)
                                     / HEAD_DIM))
    pos = jnp.arange(S, dtype=jnp.float32)
    freqs = jnp.outer(pos, inv_freq)
    emb = jnp.concatenate([freqs, freqs], axis=-1)
    cos, sin = jnp.cos(emb), jnp.sin(emb)                 # [S, D]

    def rmsnorm(v, w):
        var = jnp.mean(v * v, axis=-1, keepdims=True)
        return v * jax.lax.rsqrt(var + RMS_EPS) * w

    def rope(t):                                          # t: [B, NH, S, D]
        d2 = HEAD_DIM // 2
        t1, t2 = t[..., :d2], t[..., d2:]
        rot = jnp.concatenate([-t2, t1], axis=-1)
        return t * cos[None, None] + rot * sin[None, None]

    causal = jnp.tril(jnp.ones((S, S), bool))
    key_ok = attention_mask.astype(bool)
    valid = causal[None, None] & key_ok[:, None, None, :]
    abias = jnp.where(valid, 0.0, -1e9).astype(jnp.float32)

    def heads(t):
        return t.reshape(B, S, N_HEADS, HEAD_DIM).transpose(0, 2, 1, 3)

    for l in range(N_LAYERS):
        h = rmsnorm(x, params["ln1"][l])
        q = heads(jnp.einsum("bsh,hd->bsd", h, params["wq"][l], precision=_HP))
        k = heads(jnp.einsum("bsh,hd->bsd", h, params["wk"][l], precision=_HP))
        v = heads(jnp.einsum("bsh,hd->bsd", h, params["wv"][l], precision=_HP))
        q, k = rope(q), rope(k)
        sc = jnp.einsum("bhqd,bhkd->bhqk", q, k, precision=_HP) / np.sqrt(HEAD_DIM) + abias
        p = jax.nn.softmax(sc, axis=-1)
        attn = jnp.einsum("bhqk,bhkd->bhqd", p, v, precision=_HP)
        attn = attn.transpose(0, 2, 1, 3).reshape(B, S, HIDDEN)
        x = x + jnp.einsum("bsh,hd->bsd", attn, params["wo"][l], precision=_HP)

        h2 = rmsnorm(x, params["ln2"][l])
        g = jnp.einsum("bsh,hi->bsi", h2, params["wg"][l], precision=_HP)
        u = jnp.einsum("bsh,hi->bsi", h2, params["wu"][l], precision=_HP)
        x = x + jnp.einsum("bsi,ih->bsh", jax.nn.silu(g) * u,
                           params["wd"][l], precision=_HP)

    x = rmsnorm(x, params["final_norm"])
    return jnp.einsum("bsh,hv->bsv", x, params["lm_head"], precision=_HP)


# ---------------- main ----------------
if __name__ == "__main__":
    key = jax.random.PRNGKey(0)
    k_param, k_ids = jax.random.split(key)

    params = init_params(k_param)
    packed = pack_params(params)

    input_ids = jax.random.randint(k_ids, (BATCH, SEQ), 0, VOCAB, dtype=jnp.int32)
    attention_mask = jnp.ones((BATCH, SEQ), dtype=jnp.int32)
    attention_mask = attention_mask.at[1, -2:].set(0)   # right-pad 2nd example

    logits = jax.block_until_ready(llm_forward(packed, input_ids, attention_mask))
    assert logits.shape == (BATCH, SEQ, VOCAB)
    assert bool(jnp.all(jnp.isfinite(logits)))

    ref = jax.block_until_ready(_ref_forward(params, input_ids, attention_mask))
    # Kernel uses single-pass bf16 MXU operands vs. the f32/HIGHEST reference:
    # expected deviation ~1e-2 abs on ~0.2-scale logits; real bugs give O(0.1-1).
    np.testing.assert_allclose(np.asarray(logits), np.asarray(ref),
                               rtol=2e-2, atol=2e-2)

    print("KERNEL_OK")
</pallas_src>

<mosaic_0001>
module attributes {stable_mosaic.version = 11 : i64} {
  func.func @_fused_forward_kernel(%arg0: memref<16x128xf32, #tpu.memory_space<vmem>>, %arg1: memref<16x128xf32, #tpu.memory_space<vmem>>, %arg2: memref<16x128xf32, #tpu.memory_space<vmem>>, %arg3: memref<16x64xf32, #tpu.memory_space<vmem>>, %arg4: memref<64x128xf32, #tpu.memory_space<vmem>>, %arg5: memref<64x64xbf16, #tpu.memory_space<vmem>>, %arg6: memref<2x1x128xf32, #tpu.memory_space<vmem>>, %arg7: memref<2x128x640xbf16, #tpu.memory_space<vmem>>, %arg8: memref<2x128x128xbf16, #tpu.memory_space<vmem>>, %arg9: memref<2x1x128xf32, #tpu.memory_space<vmem>>, %arg10: memref<2x128x512xbf16, #tpu.memory_space<vmem>>, %arg11: memref<2x256x128xbf16, #tpu.memory_space<vmem>>, %arg12: memref<1x128xf32, #tpu.memory_space<vmem>>, %arg13: memref<128x256xbf16, #tpu.memory_space<vmem>>, %arg14: memref<16x256xf32, #tpu.memory_space<vmem>>) attributes {dimension_semantics = [], scalar_prefetch = 0 : i64, scratch_operands = 0 : i64, tpu.core_type = #tpu.core_type<tc>} {
    %c0 = arith.constant 0 : index
    %c0_0 = arith.constant 0 : index
    %0 = vector.load %arg0[%c0, %c0_0] : memref<16x128xf32, #tpu.memory_space<vmem>>, vector<16x128xf32>
    %c0_1 = arith.constant 0 : index
    %c0_2 = arith.constant 0 : index
    %1 = vector.load %arg1[%c0_1, %c0_2] : memref<16x128xf32, #tpu.memory_space<vmem>>, vector<16x128xf32>
    %c0_3 = arith.constant 0 : index
    %c0_4 = arith.constant 0 : index
    %2 = vector.load %arg2[%c0_3, %c0_4] : memref<16x128xf32, #tpu.memory_space<vmem>>, vector<16x128xf32>
    %c0_5 = arith.constant 0 : index
    %c0_6 = arith.constant 0 : index
    %3 = vector.load %arg3[%c0_5, %c0_6] : memref<16x64xf32, #tpu.memory_space<vmem>>, vector<16x64xf32>
    %c0_7 = arith.constant 0 : index
    %c0_8 = arith.constant 0 : index
    %4 = vector.load %arg4[%c0_7, %c0_8] : memref<64x128xf32, #tpu.memory_space<vmem>>, vector<64x128xf32>
    %c0_9 = arith.constant 0 : index
    %c0_10 = arith.constant 0 : index
    %5 = vector.load %arg5[%c0_9, %c0_10] : memref<64x64xbf16, #tpu.memory_space<vmem>>, vector<64x64xbf16>
    %c0_11 = arith.constant 0 : index
    %c0_12 = arith.constant 0 : index
    %c0_13 = arith.constant 0 : index
    %6 = vector.load %arg6[%c0_11, %c0_12, %c0_13] : memref<2x1x128xf32, #tpu.memory_space<vmem>>, vector<1x1x128xf32>
    %7 = vector.shape_cast %6 : vector<1x1x128xf32> to vector<1x128xf32>
    %8 = arith.mulf %0, %0 : vector<16x128xf32>
    %cst = arith.constant dense<0.000000e+00> : vector<16xf32>
    %9 = vector.multi_reduction <add>, %8, %cst [1] : vector<16x128xf32> to vector<16xf32>
    %10 = vector.shape_cast %9 : vector<16xf32> to vector<16x1xf32>
    %cst_14 = arith.constant 1.280000e+02 : f32
    %11 = vector.broadcast %cst_14 : f32 to vector<16x1xf32>
    %12 = arith.divf %10, %11 : vector<16x1xf32>
    %cst_15 = arith.constant 9.99999974E-6 : f32
    %13 = vector.broadcast %cst_15 : f32 to vector<16x1xf32>
    %14 = arith.addf %12, %13 : vector<16x1xf32>
    %15 = math.rsqrt %14 : vector<16x1xf32>
    %16 = vector.broadcast %15 : vector<16x1xf32> to vector<16x128xf32>
    %17 = arith.mulf %0, %16 : vector<16x128xf32>
    %18 = vector.broadcast %7 : vector<1x128xf32> to vector<16x128xf32>
    %19 = arith.mulf %17, %18 : vector<16x128xf32>
    %c0_16 = arith.constant 0 : index
    %c0_17 = arith.constant 0 : index
    %c0_18 = arith.constant 0 : index
    %20 = vector.load %arg7[%c0_16, %c0_17, %c0_18] : memref<2x128x640xbf16, #tpu.memory_space<vmem>>, vector<1x128x640xbf16>
    %21 = vector.shape_cast %20 : vector<1x128x640xbf16> to vector<128x640xbf16>
    %22 = arith.truncf %19 : vector<16x128xf32> to vector<16x128xbf16>
    %cst_19 = arith.constant dense<0.000000e+00> : vector<16x640xf32>
    %23 = tpu.matmul %22, %21, %cst_19 {dimension_numbers = #tpu.dot_dimension_numbers<[1], [0], [0], [1], [0, 0, 1, 1], [], []>} : vector<16x128xbf16>, vector<128x640xbf16>, vector<16x640xf32> -> vector<16x640xf32>
    %24 = vector.extract_strided_slice %23 {offsets = [0, 0], sizes = [16, 128], strides = [1, 1]} : vector<16x640xf32> to vector<16x128xf32>
    %25 = arith.mulf %24, %1 : vector<16x128xf32>
    %26 = vector.extract_strided_slice %23 {offsets = [0, 128], sizes = [16, 128], strides = [1, 1]} : vector<16x640xf32> to vector<16x128xf32>
    %27 = arith.mulf %26, %2 : vector<16x128xf32>
    %28 = arith.addf %25, %27 : vector<16x128xf32>
    %29 = vector.extract_strided_slice %23 {offsets = [0, 256], sizes = [16, 128], strides = [1, 1]} : vector<16x640xf32> to vector<16x128xf32>
    %30 = arith.mulf %29, %1 : vector<16x128xf32>
    %31 = vector.extract_strided_slice %23 {offsets = [0, 384], sizes = [16, 128], strides = [1, 1]} : vector<16x640xf32> to vector<16x128xf32>
    %32 = arith.mulf %31, %2 : vector<16x128xf32>
    %33 = arith.addf %30, %32 : vector<16x128xf32>
    %34 = vector.extract_strided_slice %23 {offsets = [0, 512], sizes = [16, 128], strides = [1, 1]} : vector<16x640xf32> to vector<16x128xf32>
    %35 = tpu.concatenate %33, %33, %33, %33 in 0 : vector<16x128xf32>, vector<16x128xf32>, vector<16x128xf32>, vector<16x128xf32> -> vector<64x128xf32>
    %36 = arith.mulf %35, %4 : vector<64x128xf32>
    %37 = tpu.concatenate %34, %34, %34, %34 in 0 : vector<16x128xf32>, vector<16x128xf32>, vector<16x128xf32>, vector<16x128xf32> -> vector<64x128xf32>
    %38 = arith.mulf %37, %4 : vector<64x128xf32>
    %39 = arith.truncf %28 : vector<16x128xf32> to vector<16x128xbf16>
    %40 = arith.truncf %36 : vector<64x128xf32> to vector<64x128xbf16>
    %cst_20 = arith.constant dense<0.000000e+00> : vector<16x64xf32>
    %41 = tpu.matmul %39, %40, %cst_20 {dimension_numbers = #tpu.dot_dimension_numbers<[1], [1], [0], [0], [0, 0, 1, 0], [], []>} : vector<16x128xbf16>, vector<64x128xbf16>, vector<16x64xf32> -> vector<16x64xf32>
    %42 = arith.addf %41, %3 : vector<16x64xf32>
    %cst_21 = arith.constant dense<0xFF800000> : vector<16xf32>
    %43 = vector.multi_reduction <maximumf>, %42, %cst_21 [1] : vector<16x64xf32> to vector<16xf32>
    %44 = vector.shape_cast %43 : vector<16xf32> to vector<16x1xf32>
    %45 = vector.broadcast %44 : vector<16x1xf32> to vector<16x64xf32>
    %46 = arith.subf %42, %45 : vector<16x64xf32>
    %47 = math.exp %46 : vector<16x64xf32>
    %48 = arith.truncf %47 : vector<16x64xf32> to vector<16x64xbf16>
    %cst_22 = arith.constant dense<0.000000e+00> : vector<16x64xf32>
    %49 = tpu.matmul %48, %5, %cst_22 {dimension_numbers = #tpu.dot_dimension_numbers<[1], [0], [0], [1], [0, 0, 1, 1], [], []>} : vector<16x64xbf16>, vector<64x64xbf16>, vector<16x64xf32> -> vector<16x64xf32>
    %50 = tpu.reciprocal %49 {approx = true} : vector<16x64xf32> -> vector<16x64xf32>
    %51 = arith.mulf %47, %50 : vector<16x64xf32>
    %52 = arith.truncf %51 : vector<16x64xf32> to vector<16x64xbf16>
    %53 = arith.truncf %38 : vector<64x128xf32> to vector<64x128xbf16>
    %cst_23 = arith.constant dense<0.000000e+00> : vector<16x128xf32>
    %54 = tpu.matmul %52, %53, %cst_23 {dimension_numbers = #tpu.dot_dimension_numbers<[1], [0], [0], [1], [0, 0, 1, 1], [], []>} : vector<16x64xbf16>, vector<64x128xbf16>, vector<16x128xf32> -> vector<16x128xf32>
    %c0_24 = arith.constant 0 : index
    %c0_25 = arith.constant 0 : index
    %c0_26 = arith.constant 0 : index
    %55 = vector.load %arg8[%c0_24, %c0_25, %c0_26] : memref<2x128x128xbf16, #tpu.memory_space<vmem>>, vector<1x128x128xbf16>
    %56 = vector.shape_cast %55 : vector<1x128x128xbf16> to vector<128x128xbf16>
    %57 = arith.truncf %54 : vector<16x128xf32> to vector<16x128xbf16>
    %cst_27 = arith.constant dense<0.000000e+00> : vector<16x128xf32>
    %58 = tpu.matmul %57, %56, %cst_27 {dimension_numbers = #tpu.dot_dimension_numbers<[1], [0], [0], [1], [0, 0, 1, 1], [], []>} : vector<16x128xbf16>, vector<128x128xbf16>, vector<16x128xf32> -> vector<16x128xf32>
    %59 = arith.addf %0, %58 : vector<16x128xf32>
    %c0_28 = arith.constant 0 : index
    %c0_29 = arith.constant 0 : index
    %c0_30 = arith.constant 0 : index
    %60 = vector.load %arg9[%c0_28, %c0_29, %c0_30] : memref<2x1x128xf32, #tpu.memory_space<vmem>>, vector<1x1x128xf32>
    %61 = vector.shape_cast %60 : vector<1x1x128xf32> to vector<1x128xf32>
    %62 = arith.mulf %59, %59 : vector<16x128xf32>
    %cst_31 = arith.constant dense<0.000000e+00> : vector<16xf32>
    %63 = vector.multi_reduction <add>, %62, %cst_31 [1] : vector<16x128xf32> to vector<16xf32>
    %64 = vector.shape_cast %63 : vector<16xf32> to vector<16x1xf32>
    %cst_32 = arith.constant 1.280000e+02 : f32
    %65 = vector.broadcast %cst_32 : f32 to vector<16x1xf32>
    %66 = arith.divf %64, %65 : vector<16x1xf32>
    %cst_33 = arith.constant 9.99999974E-6 : f32
    %67 = vector.broadcast %cst_33 : f32 to vector<16x1xf32>
    %68 = arith.addf %66, %67 : vector<16x1xf32>
    %69 = math.rsqrt %68 : vector<16x1xf32>
    %70 = vector.broadcast %69 : vector<16x1xf32> to vector<16x128xf32>
    %71 = arith.mulf %59, %70 : vector<16x128xf32>
    %72 = vector.broadcast %61 : vector<1x128xf32> to vector<16x128xf32>
    %73 = arith.mulf %71, %72 : vector<16x128xf32>
    %c0_34 = arith.constant 0 : index
    %c0_35 = arith.constant 0 : index
    %c0_36 = arith.constant 0 : index
    %74 = vector.load %arg10[%c0_34, %c0_35, %c0_36] : memref<2x128x512xbf16, #tpu.memory_space<vmem>>, vector<1x128x512xbf16>
    %75 = vector.shape_cast %74 : vector<1x128x512xbf16> to vector<128x512xbf16>
    %76 = arith.truncf %73 : vector<16x128xf32> to vector<16x128xbf16>
    %cst_37 = arith.constant dense<0.000000e+00> : vector<16x512xf32>
    %77 = tpu.matmul %76, %75, %cst_37 {dimension_numbers = #tpu.dot_dimension_numbers<[1], [0], [0], [1], [0, 0, 1, 1], [], []>} : vector<16x128xbf16>, vector<128x512xbf16>, vector<16x512xf32> -> vector<16x512xf32>
    %78 = vector.extract_strided_slice %77 {offsets = [0, 0], sizes = [16, 256], strides = [1, 1]} : vector<16x512xf32> to vector<16x256xf32>
    %79 = vector.extract_strided_slice %77 {offsets = [0, 256], sizes = [16, 256], strides = [1, 1]} : vector<16x512xf32> to vector<16x256xf32>
    %80 = arith.negf %78 : vector<16x256xf32>
    %81 = math.exp %80 : vector<16x256xf32>
    %cst_38 = arith.constant 1.000000e+00 : f32
    %82 = vector.broadcast %cst_38 : f32 to vector<16x256xf32>
    %83 = arith.addf %82, %81 : vector<16x256xf32>
    %84 = arith.divf %82, %83 : vector<16x256xf32>
    %85 = arith.mulf %78, %84 : vector<16x256xf32>
    %86 = arith.mulf %85, %79 : vector<16x256xf32>
    %c0_39 = arith.constant 0 : index
    %c0_40 = arith.constant 0 : index
    %c0_41 = arith.constant 0 : index
    %87 = vector.load %arg11[%c0_39, %c0_40, %c0_41] : memref<2x256x128xbf16, #tpu.memory_space<vmem>>, vector<1x256x128xbf16>
    %88 = vector.shape_cast %87 : vector<1x256x128xbf16> to vector<256x128xbf16>
    %89 = arith.truncf %86 : vector<16x256xf32> to vector<16x256xbf16>
    %cst_42 = arith.constant dense<0.000000e+00> : vector<16x128xf32>
    %90 = tpu.matmul %89, %88, %cst_42 {dimension_numbers = #tpu.dot_dimension_numbers<[1], [0], [0], [1], [0, 0, 1, 1], [], []>} : vector<16x256xbf16>, vector<256x128xbf16>, vector<16x128xf32> -> vector<16x128xf32>
    %91 = arith.addf %59, %90 : vector<16x128xf32>
    %c1 = arith.constant 1 : index
    %c0_43 = arith.constant 0 : index
    %c0_44 = arith.constant 0 : index
    %92 = vector.load %arg6[%c1, %c0_43, %c0_44] : memref<2x1x128xf32, #tpu.memory_space<vmem>>, vector<1x1x128xf32>
    %93 = vector.shape_cast %92 : vector<1x1x128xf32> to vector<1x128xf32>
    %94 = arith.mulf %91, %91 : vector<16x128xf32>
    %cst_45 = arith.constant dense<0.000000e+00> : vector<16xf32>
    %95 = vector.multi_reduction <add>, %94, %cst_45 [1] : vector<16x128xf32> to vector<16xf32>
    %96 = vector.shape_cast %95 : vector<16xf32> to vector<16x1xf32>
    %cst_46 = arith.constant 1.280000e+02 : f32
    %97 = vector.broadcast %cst_46 : f32 to vector<16x1xf32>
    %98 = arith.divf %96, %97 : vector<16x1xf32>
    %cst_47 = arith.constant 9.99999974E-6 : f32
    %99 = vector.broadcast %cst_47 : f32 to vector<16x1xf32>
    %100 = arith.addf %98, %99 : vector<16x1xf32>
    %101 = math.rsqrt %100 : vector<16x1xf32>
    %102 = vector.broadcast %101 : vector<16x1xf32> to vector<16x128xf32>
    %103 = arith.mulf %91, %102 : vector<16x128xf32>
    %104 = vector.broadcast %93 : vector<1x128xf32> to vector<16x128xf32>
    %105 = arith.mulf %103, %104 : vector<16x128xf32>
    %c1_48 = arith.constant 1 : index
    %c0_49 = arith.constant 0 : index
    %c0_50 = arith.constant 0 : index
    %106 = vector.load %arg7[%c1_48, %c0_49, %c0_50] : memref<2x128x640xbf16, #tpu.memory_space<vmem>>, vector<1x128x640xbf16>
    %107 = vector.shape_cast %106 : vector<1x128x640xbf16> to vector<128x640xbf16>
    %108 = arith.truncf %105 : vector<16x128xf32> to vector<16x128xbf16>
    %cst_51 = arith.constant dense<0.000000e+00> : vector<16x640xf32>
    %109 = tpu.matmul %108, %107, %cst_51 {dimension_numbers = #tpu.dot_dimension_numbers<[1], [0], [0], [1], [0, 0, 1, 1], [], []>} : vector<16x128xbf16>, vector<128x640xbf16>, vector<16x640xf32> -> vector<16x640xf32>
    %110 = vector.extract_strided_slice %109 {offsets = [0, 0], sizes = [16, 128], strides = [1, 1]} : vector<16x640xf32> to vector<16x128xf32>
    %111 = arith.mulf %110, %1 : vector<16x128xf32>
    %112 = vector.extract_strided_slice %109 {offsets = [0, 128], sizes = [16, 128], strides = [1, 1]} : vector<16x640xf32> to vector<16x128xf32>
    %113 = arith.mulf %112, %2 : vector<16x128xf32>
    %114 = arith.addf %111, %113 : vector<16x128xf32>
    %115 = vector.extract_strided_slice %109 {offsets = [0, 256], sizes = [16, 128], strides = [1, 1]} : vector<16x640xf32> to vector<16x128xf32>
    %116 = arith.mulf %115, %1 : vector<16x128xf32>
    %117 = vector.extract_strided_slice %109 {offsets = [0, 384], sizes = [16, 128], strides = [1, 1]} : vector<16x640xf32> to vector<16x128xf32>
    %118 = arith.mulf %117, %2 : vector<16x128xf32>
    %119 = arith.addf %116, %118 : vector<16x128xf32>
    %120 = vector.extract_strided_slice %109 {offsets = [0, 512], sizes = [16, 128], strides = [1, 1]} : vector<16x640xf32> to vector<16x128xf32>
    %121 = tpu.concatenate %119, %119, %119, %119 in 0 : vector<16x128xf32>, vector<16x128xf32>, vector<16x128xf32>, vector<16x128xf32> -> vector<64x128xf32>
    %122 = arith.mulf %121, %4 : vector<64x128xf32>
    %123 = tpu.concatenate %120, %120, %120, %120 in 0 : vector<16x128xf32>, vector<16x128xf32>, vector<16x128xf32>, vector<16x128xf32> -> vector<64x128xf32>
    %124 = arith.mulf %123, %4 : vector<64x128xf32>
    %125 = arith.truncf %114 : vector<16x128xf32> to vector<16x128xbf16>
    %126 = arith.truncf %122 : vector<64x128xf32> to vector<64x128xbf16>
    %cst_52 = arith.constant dense<0.000000e+00> : vector<16x64xf32>
    %127 = tpu.matmul %125, %126, %cst_52 {dimension_numbers = #tpu.dot_dimension_numbers<[1], [1], [0], [0], [0, 0, 1, 0], [], []>} : vector<16x128xbf16>, vector<64x128xbf16>, vector<16x64xf32> -> vector<16x64xf32>
    %128 = arith.addf %127, %3 : vector<16x64xf32>
    %cst_53 = arith.constant dense<0xFF800000> : vector<16xf32>
    %129 = vector.multi_reduction <maximumf>, %128, %cst_53 [1] : vector<16x64xf32> to vector<16xf32>
    %130 = vector.shape_cast %129 : vector<16xf32> to vector<16x1xf32>
    %131 = vector.broadcast %130 : vector<16x1xf32> to vector<16x64xf32>
    %132 = arith.subf %128, %131 : vector<16x64xf32>
    %133 = math.exp %132 : vector<16x64xf32>
    %134 = arith.truncf %133 : vector<16x64xf32> to vector<16x64xbf16>
    %cst_54 = arith.constant dense<0.000000e+00> : vector<16x64xf32>
    %135 = tpu.matmul %134, %5, %cst_54 {dimension_numbers = #tpu.dot_dimension_numbers<[1], [0], [0], [1], [0, 0, 1, 1], [], []>} : vector<16x64xbf16>, vector<64x64xbf16>, vector<16x64xf32> -> vector<16x64xf32>
    %136 = tpu.reciprocal %135 {approx = true} : vector<16x64xf32> -> vector<16x64xf32>
    %137 = arith.mulf %133, %136 : vector<16x64xf32>
    %138 = arith.truncf %137 : vector<16x64xf32> to vector<16x64xbf16>
    %139 = arith.truncf %124 : vector<64x128xf32> to vector<64x128xbf16>
    %cst_55 = arith.constant dense<0.000000e+00> : vector<16x128xf32>
    %140 = tpu.matmul %138, %139, %cst_55 {dimension_numbers = #tpu.dot_dimension_numbers<[1], [0], [0], [1], [0, 0, 1, 1], [], []>} : vector<16x64xbf16>, vector<64x128xbf16>, vector<16x128xf32> -> vector<16x128xf32>
    %c1_56 = arith.constant 1 : index
    %c0_57 = arith.constant 0 : index
    %c0_58 = arith.constant 0 : index
    %141 = vector.load %arg8[%c1_56, %c0_57, %c0_58] : memref<2x128x128xbf16, #tpu.memory_space<vmem>>, vector<1x128x128xbf16>
    %142 = vector.shape_cast %141 : vector<1x128x128xbf16> to vector<128x128xbf16>
    %143 = arith.truncf %140 : vector<16x128xf32> to vector<16x128xbf16>
    %cst_59 = arith.constant dense<0.000000e+00> : vector<16x128xf32>
    %144 = tpu.matmul %143, %142, %cst_59 {dimension_numbers = #tpu.dot_dimension_numbers<[1], [0], [0], [1], [0, 0, 1, 1], [], []>} : vector<16x128xbf16>, vector<128x128xbf16>, vector<16x128xf32> -> vector<16x128xf32>
    %145 = arith.addf %91, %144 : vector<16x128xf32>
    %c1_60 = arith.constant 1 : index
    %c0_61 = arith.constant 0 : index
    %c0_62 = arith.constant 0 : index
    %146 = vector.load %arg9[%c1_60, %c0_61, %c0_62] : memref<2x1x128xf32, #tpu.memory_space<vmem>>, vector<1x1x128xf32>
    %147 = vector.shape_cast %146 : vector<1x1x128xf32> to vector<1x128xf32>
    %148 = arith.mulf %145, %145 : vector<16x128xf32>
    %cst_63 = arith.constant dense<0.000000e+00> : vector<16xf32>
    %149 = vector.multi_reduction <add>, %148, %cst_63 [1] : vector<16x128xf32> to vector<16xf32>
    %150 = vector.shape_cast %149 : vector<16xf32> to vector<16x1xf32>
    %cst_64 = arith.constant 1.280000e+02 : f32
    %151 = vector.broadcast %cst_64 : f32 to vector<16x1xf32>
    %152 = arith.divf %150, %151 : vector<16x1xf32>
    %cst_65 = arith.constant 9.99999974E-6 : f32
    %153 = vector.broadcast %cst_65 : f32 to vector<16x1xf32>
    %154 = arith.addf %152, %153 : vector<16x1xf32>
    %155 = math.rsqrt %154 : vector<16x1xf32>
    %156 = vector.broadcast %155 : vector<16x1xf32> to vector<16x128xf32>
    %157 = arith.mulf %145, %156 : vector<16x128xf32>
    %158 = vector.broadcast %147 : vector<1x128xf32> to vector<16x128xf32>
    %159 = arith.mulf %157, %158 : vector<16x128xf32>
    %c1_66 = arith.constant 1 : index
    %c0_67 = arith.constant 0 : index
    %c0_68 = arith.constant 0 : index
    %160 = vector.load %arg10[%c1_66, %c0_67, %c0_68] : memref<2x128x512xbf16, #tpu.memory_space<vmem>>, vector<1x128x512xbf16>
    %161 = vector.shape_cast %160 : vector<1x128x512xbf16> to vector<128x512xbf16>
    %162 = arith.truncf %159 : vector<16x128xf32> to vector<16x128xbf16>
    %cst_69 = arith.constant dense<0.000000e+00> : vector<16x512xf32>
    %163 = tpu.matmul %162, %161, %cst_69 {dimension_numbers = #tpu.dot_dimension_numbers<[1], [0], [0], [1], [0, 0, 1, 1], [], []>} : vector<16x128xbf16>, vector<128x512xbf16>, vector<16x512xf32> -> vector<16x512xf32>
    %164 = vector.extract_strided_slice %163 {offsets = [0, 0], sizes = [16, 256], strides = [1, 1]} : vector<16x512xf32> to vector<16x256xf32>
    %165 = vector.extract_strided_slice %163 {offsets = [0, 256], sizes = [16, 256], strides = [1, 1]} : vector<16x512xf32> to vector<16x256xf32>
    %166 = arith.negf %164 : vector<16x256xf32>
    %167 = math.exp %166 : vector<16x256xf32>
    %cst_70 = arith.constant 1.000000e+00 : f32
    %168 = vector.broadcast %cst_70 : f32 to vector<16x256xf32>
    %169 = arith.addf %168, %167 : vector<16x256xf32>
    %170 = arith.divf %168, %169 : vector<16x256xf32>
    %171 = arith.mulf %164, %170 : vector<16x256xf32>
    %172 = arith.mulf %171, %165 : vector<16x256xf32>
    %c1_71 = arith.constant 1 : index
    %c0_72 = arith.constant 0 : index
    %c0_73 = arith.constant 0 : index
    %173 = vector.load %arg11[%c1_71, %c0_72, %c0_73] : memref<2x256x128xbf16, #tpu.memory_space<vmem>>, vector<1x256x128xbf16>
    %174 = vector.shape_cast %173 : vector<1x256x128xbf16> to vector<256x128xbf16>
    %175 = arith.truncf %172 : vector<16x256xf32> to vector<16x256xbf16>
    %cst_74 = arith.constant dense<0.000000e+00> : vector<16x128xf32>
    %176 = tpu.matmul %175, %174, %cst_74 {dimension_numbers = #tpu.dot_dimension_numbers<[1], [0], [0], [1], [0, 0, 1, 1], [], []>} : vector<16x256xbf16>, vector<256x128xbf16>, vector<16x128xf32> -> vector<16x128xf32>
    %177 = arith.addf %145, %176 : vector<16x128xf32>
    %c0_75 = arith.constant 0 : index
    %c0_76 = arith.constant 0 : index
    %178 = vector.load %arg12[%c0_75, %c0_76] : memref<1x128xf32, #tpu.memory_space<vmem>>, vector<1x128xf32>
    %179 = arith.mulf %177, %177 : vector<16x128xf32>
    %cst_77 = arith.constant dense<0.000000e+00> : vector<16xf32>
    %180 = vector.multi_reduction <add>, %179, %cst_77 [1] : vector<16x128xf32> to vector<16xf32>
    %181 = vector.shape_cast %180 : vector<16xf32> to vector<16x1xf32>
    %cst_78 = arith.constant 1.280000e+02 : f32
    %182 = vector.broadcast %cst_78 : f32 to vector<16x1xf32>
    %183 = arith.divf %181, %182 : vector<16x1xf32>
    %cst_79 = arith.constant 9.99999974E-6 : f32
    %184 = vector.broadcast %cst_79 : f32 to vector<16x1xf32>
    %185 = arith.addf %183, %184 : vector<16x1xf32>
    %186 = math.rsqrt %185 : vector<16x1xf32>
    %187 = vector.broadcast %186 : vector<16x1xf32> to vector<16x128xf32>
    %188 = arith.mulf %177, %187 : vector<16x128xf32>
    %189 = vector.broadcast %178 : vector<1x128xf32> to vector<16x128xf32>
    %190 = arith.mulf %188, %189 : vector<16x128xf32>
    %c0_80 = arith.constant 0 : index
    %c0_81 = arith.constant 0 : index
    %191 = vector.load %arg13[%c0_80, %c0_81] : memref<128x256xbf16, #tpu.memory_space<vmem>>, vector<128x256xbf16>
    %192 = arith.truncf %190 : vector<16x128xf32> to vector<16x128xbf16>
    %cst_82 = arith.constant dense<0.000000e+00> : vector<16x256xf32>
    %193 = tpu.matmul %192, %191, %cst_82 {dimension_numbers = #tpu.dot_dimension_numbers<[1], [0], [0], [1], [0, 0, 1, 1], [], []>} : vector<16x128xbf16>, vector<128x256xbf16>, vector<16x256xf32> -> vector<16x256xf32>
    %c0_83 = arith.constant 0 : index
    %c0_84 = arith.constant 0 : index
    %194 = vector.load %arg14[%c0_83, %c0_84] : memref<16x256xf32, #tpu.memory_space<vmem>>, vector<16x256xf32>
    tpu.vector_store %arg14[%c0_83, %c0_84], %193 {strides = array<i32>} : memref<16x256xf32, #tpu.memory_space<vmem>>, vector<16x256xf32>,
    return
  }
}

</mosaic_0001>

<bundles_post_ra>
// kernel: tile.9
= control target key start
LH: loop header
LB: loop body
LE: loop exit
PB: predicated region body
PF: predicated region fallthrough
CT: control target
= control target key end

     0   :  { %vm83_vm0 = vcmask 1047556   ;;  %vm85_vm1 = vcmask 130048   ;;  %s196_s9 = smov 48   ;;  %s197_s14 = smov 16   ;;  %vm104_vm2 = vcmask 523648   ;;  %vm125_vm3 = vcmask 392448   ;;  %s290_s0 = inlined_call_operand.vmem [shape: f32[16,4,16], index: 0, kind: input, shape index: {}]   ;;  %s291_s1 = inlined_call_operand.vmem [shape: f32[16,64], index: 1, kind: output, shape index: {}]  }
   0x1   :  { %v181_v0 = vld [vmem:[%s290_s0 + $0x1c] sm:$0xf]  ;;  %v182_v1 = vld [vmem:[%s290_s0 + $0x18] sm:$0xf]  ;;  %v183_v2 = vld [vmem:[%s290_s0 + $0x14] sm:$0xf] }
   0x2   :  { %49 = vst [vmem:[#allocation0 + $0x38] sm:$0xf] %v181_v0  ;;  %54 = vst [vmem:[#allocation0 + $0x30] sm:$0xf] %v182_v1  ;;  %v184_v3 = vld [vmem:[%s290_s0 + $0x10] sm:$0xf] }
   0x3   :  { %59 = vst [vmem:[#allocation0 + $0x28] sm:$0xf] %v183_v2  ;;  %v185_v4 = vld [vmem:[%s290_s0 + $0xc] sm:$0xf]  ;;  %v186_v5 = vld [vmem:[%s290_s0 + $0x8] sm:$0xf] }
   0x4   :  { %64 = vst [vmem:[#allocation0 + $0x20] sm:$0xf] %v184_v3  ;;  %69 = vst [vmem:[#allocation0 + $0x18] sm:$0xf] %v185_v4  ;;  %v187_v6 = vld [vmem:[%s290_s0 + $0x4] sm:$0xf] }
   0x5   :  { %74 = vst [vmem:[#allocation0 + $0x10] sm:$0xf] %v186_v5  ;;  %v79_v7 = vld [vmem:[%s290_s0] sm:$0xf]  ;;  %78 = vst [vmem:[#allocation0 + $0x8] sm:$0xf] %v187_v6 }
   0x6   :  { %80 = vst [vmem:[#allocation0] sm:$0xf] %v79_v7  ;;  %v173_v8 = vld [vmem:[%s290_s0 + $0x3c] sm:$0xf]  ;;  %v174_v9 = vld [vmem:[%s290_s0 + $0x38] sm:$0xf] }
   0x7   :  { %9 = vst [vmem:[#allocation0 + $0x78] sm:$0xf] %v173_v8  ;;  %14 = vst [vmem:[#allocation0 + $0x70] sm:$0xf] %v174_v9  ;;  %v175_v10 = vld [vmem:[%s290_s0 + $0x34] sm:$0xf] }
   0x8   :  { %v176_v11 = vld [vmem:[%s290_s0 + $0x30] sm:$0xf]  ;;  %v177_v12 = vld [vmem:[%s290_s0 + $0x2c] sm:$0xf]  ;;  %19 = vst [vmem:[#allocation0 + $0x68] sm:$0xf] %v175_v10 }
   0x9   :  { %24 = vst [vmem:[#allocation0 + $0x60] sm:$0xf] %v176_v11  ;;  %29 = vst [vmem:[#allocation0 + $0x58] sm:$0xf] %v177_v12  ;;  %v178_v13 = vld [vmem:[%s290_s0 + $0x28] sm:$0xf] }
   0xa   :  { %v179_v14 = vld [vmem:[%s290_s0 + $0x24] sm:$0xf]  ;;  %v180_v15 = vld [vmem:[%s290_s0 + $0x20] sm:$0xf]  ;;  %34 = vst [vmem:[#allocation0 + $0x50] sm:$0xf] %v178_v13 }
   0xb   :  { %39 = vst [vmem:[#allocation0 + $0x48] sm:$0xf] %v179_v14  ;;  %44 = vst [vmem:[#allocation0 + $0x40] sm:$0xf] %v180_v15  ;;  %s195_s0 = smov 32   ;;  %vm146_vm4 = vcmask 261248  }
   0xc   :  { %v120_v16 = vld [vmem:[#allocation0 + $0x2] ss:$8 sm:$0xf0]   ;;  %v99_v17 = vld [vmem:[#allocation0 + $0x3] ss:$8 sm:$0xf0]  }
   0xd   :  { %v118_v18 = vld [vmem:[#allocation0 + $0x2] ss:$8 sm:$0xf]   ;;  %v97_v19 = vld [vmem:[#allocation0 + $0x3] ss:$8 sm:$0xf]  }
   0xe   :  { %v122_v20 = vsel %vm83_vm0, %v120_v16, %v118_v18  ;;  %v101_v21 = vsel %vm83_vm0, %v99_v17, %v97_v19  ;;  %v139_v24 = vld [vmem:[#allocation0 + $0x1] ss:$8 sm:$0xf]   ;;  %v81_v32 = vld [vmem:[#allocation0] ss:$8 sm:$0xf]  }
   0xf   :  { %123 = vrot.lane.b32.xlu1 %v122_v20, %s195_s0  ;;  %102 = vrot.lane.b32.xlu0 %v101_v21, %s196_s9  ;;  %v141_v25 = vld [vmem:[#allocation0 + $0x1] ss:$8 sm:$0xf0]   ;;  %v82_v33 = vld [vmem:[#allocation0] ss:$8 sm:$0xf0]  }
  0x10   :  { %v130_v22 = vld [vmem:[#allocation0 + $0x42] ss:$8 sm:$0xf0]   ;;  %v109_v23 = vld [vmem:[#allocation0 + $0x43] ss:$8 sm:$0xf0]   ;;  %v84_v34 = vsel %vm83_vm0, %v82_v33, %v81_v32  ;;  %v143_v38 = vsel %vm83_vm0, %v141_v25, %v139_v24 }
  0x11   :  { %v151_v31 = vld [vmem:[#allocation0 + $0x41] ss:$8 sm:$0xf0]   ;;  %v90_v36 = vld [vmem:[#allocation0 + $0x40] ss:$8 sm:$0xf0]  }
  0x12   :  { %v128_v26 = vld [vmem:[#allocation0 + $0x42] ss:$8 sm:$0xf]   ;;  %v107_v27 = vld [vmem:[#allocation0 + $0x43] ss:$8 sm:$0xf]  }
  0x13   :  { %v132_v28 = vsel %vm83_vm0, %v130_v22, %v128_v26  ;;  %v111_v29 = vsel %vm83_vm0, %v109_v23, %v107_v27  ;;  %v149_v30 = vld [vmem:[#allocation0 + $0x41] ss:$8 sm:$0xf]   ;;  %v88_v35 = vld [vmem:[#allocation0 + $0x40] ss:$8 sm:$0xf]  }
  0x14   :  { %133 = vrot.lane.b32.xlu1 %v132_v28, %s195_s0  ;;  %112 = vrot.lane.b32.xlu0 %v111_v29, %s196_s9  ;;  %v153_v37 = vsel %vm83_vm0, %v151_v31, %v149_v30  ;;  %86 = vst.msk [vmem:[%s291_s1] sm:$0xff] %vm85_vm1, %v84_v34   ;;  %v92_v39 = vsel %vm83_vm0, %v90_v36, %v88_v35 }
  0x15   :  { %188 = vst.msk [vmem:[%s291_s1 + $0x8] sm:$0xff] %vm85_vm1, %v92_v39  }
  0x18   :  { %154 = vrot.lane.b32.xlu1 %v153_v37, %s197_s14  ;;  %144 = vrot.lane.b32.xlu0 %v143_v38, %s197_s14 }
  0x81   :  { %v124_v40 = vpop.permute.xlu1 %123   ;;  %v103_v41 = vpop.permute.xlu0 %102  }
  0x82   :  { %105 = vst.msk [vmem:[%s291_s1] sm:$0xff] %vm104_vm2, %v103_v41  }
  0x83   :  { %126 = vst.msk [vmem:[%s291_s1] sm:$0xff] %vm125_vm3, %v124_v40  }
  0x86   :  { %v134_v42 = vpop.permute.xlu1 %133   ;;  %v113_v43 = vpop.permute.xlu0 %112  }
  0x87   :  { %189 = vst.msk [vmem:[%s291_s1 + $0x8] sm:$0xff] %vm104_vm2, %v113_v43  }
  0x88   :  { %190 = vst.msk [vmem:[%s291_s1 + $0x8] sm:$0xff] %vm125_vm3, %v134_v42  }
  0x8a   :  { %v155_v44 = vpop.permute.xlu1 %154   ;;  %v145_v45 = vpop.permute.xlu0 %144  }
  0x8b   :  { %191 = vst.msk [vmem:[%s291_s1 + $0x8] sm:$0xff] %vm146_vm4, %v155_v44   ;;  %147 = vst.msk [vmem:[%s291_s1] sm:$0xff] %vm146_vm4, %v145_v45  }

// kernel: llm_forward.1
= control target key start
LH: loop header
LB: loop body
LE: loop exit
PB: predicated region body
PF: predicated region fallthrough
CT: control target
= control target key end

     0   :  { %19 = vsyncpa [#allocation3], 0  ;;  %s4510_s0 = inlined_call_operand.vmem [shape: f32[16,128], index: 0, kind: input, shape index: {}]   ;;  %s4511_s1 = inlined_call_operand.vmem [shape: f32[16,128], index: 1, kind: input, shape index: {}]   ;;  %s4512_s2 = inlined_call_operand.hbm [shape: f32[16,128], index: 2, kind: input, shape index: {}]   ;;  %s4513_s3 = inlined_call_operand.vmem [shape: f32[16,64], index: 3, kind: input, shape index: {}]   ;;  %s4514_s4 = inlined_call_operand.hbm [shape: f32[64,128], index: 4, kind: input, shape index: {}]   ;;  %s4515_s5 = inlined_call_operand.hbm [shape: bf16[64,64], index: 5, kind: input, shape index: {}]   ;;  %s4516_s6 = inlined_call_operand.hbm [shape: f32[2,1,128], index: 6, kind: input, shape index: {}]   ;;  %s4517_s7 = inlined_call_operand.hbm [shape: bf16[2,128,640], index: 7, kind: input, shape index: {}]   ;;  %s4518_s8 = inlined_call_operand.vmem [shape: bf16[2,128,128], index: 8, kind: input, shape index: {}]   ;;  %s4519_s9 = inlined_call_operand.hbm [shape: f32[2,1,128], index: 9, kind: input, shape index: {}]   ;;  %s4520_s10 = inlined_call_operand.hbm [shape: bf16[2,128,512], index: 10, kind: input, shape index: {}]   ;;  %s4521_s11 = inlined_call_operand.vmem [shape: bf16[2,256,128], index: 11, kind: input, shape index: {}]   ;;  %s4522_s12 = inlined_call_operand.hbm [shape: f32[1,128], index: 12, kind: input, shape index: {}]   ;;  %s4523_s13 = inlined_call_operand.hbm [shape: bf16[128,256], index: 13, kind: input, shape index: {}]   ;;  %s4524_s14 = inlined_call_operand.hbm [shape: f32[16,256], index: 14, kind: output, shape index: {}]  }
   0x1   :  { %20 = vsyncpa [#allocation6], 0 }
   0x2   :  { %21 = vsyncpa [#allocation9], 0 }
   0x3   :  { %22 = vsyncpa [#allocation12], 0 }
   0x4   :  { %23 = vsyncpa [#allocation15], 0 }
   0x5   :  { %24 = vsyncpa [#allocation4], 0  ;;  %s3952_s29 = smov [#allocation5]   ;;  %s3953_s15 = smov [#allocation8]  }
   0x6   :  { %s48_s30 = sshll.u32 %s3952_s29, 4  ;;  %s72_s16 = sshll.u32 %s3953_s15, 4  ;;  %s49_s30 = int_to_ptr.vmem [resolvable:$true] %s48_s30  ;;  %s73_s16 = int_to_ptr.vmem [resolvable:$true] %s72_s16 }
   0x7   :  { %s3748_s17 = scalar_lea.vmem %s49_s30, 1024  ;;  %p3753_p1 = scmp.lt.s32.totalorder %s49_s30, %s49_s30 }
   0x8   :  { %p3749_p0 = scmp.ne.s32.totalorder %s49_s30, %s3748_s17  ;;  %p3754_p2 = scmp.lt.s32.totalorder %s3748_s17, %s3748_s17 }
   0xa   :  { %p3755_p3 = por %p3754_p2, %p3753_p1 }
   0xc   :  { %p3756_p4 = pnand %p3755_p3, %p3749_p0 }
   0xe   :  { %3759 = shalt.err (!%p3756_p4)
}
   0xf   :  { %s3954_s18 = smov 128   ;;  %s3955_s19 = smov 8  }
  0x10   :  { %54 = dma.hbm_to_vmem [thread:$0]  %s4514_s4, 1024, %s49_s30, [#allocation6], %s3954_s18, %s3954_s18, %s3955_s19  }
  0x11   :  { %s3768_s22 = scalar_lea.vmem %s73_s16, 32  ;;  %p3773_p6 = scmp.lt.s32.totalorder %s73_s16, %s73_s16 }
  0x12   :  { %p3769_p5 = scmp.ne.s32.totalorder %s73_s16, %s3768_s22  ;;  %p3774_p7 = scmp.lt.s32.totalorder %s3768_s22, %s3768_s22 }
  0x14   :  { %p3775_p8 = por %p3774_p7, %p3773_p6 }
  0x16   :  { %p3776_p9 = pnand %p3775_p8, %p3769_p5 }
  0x18   :  { %3779 = shalt.err (!%p3776_p9)
}
  0x19   :  { %s3956_s23 = smov 16   ;;  %s3957_s24 = smov 1  }
  0x1a   :  { %78 = dma.hbm_to_vmem [thread:$0]  %s4516_s6, 32, %s73_s16, [#allocation9], %s3956_s23, %s3956_s23, %s3957_s24  }
  0x1b   :  { %s3958_s27 = smov [#allocation11]   ;;  %s3959_s29 = smov [#allocation14]  }
  0x1c   :  { %s98_s28 = sshll.u32 %s3958_s27, 4  ;;  %s125_s15 = sshll.u32 %s3959_s29, 4  ;;  %s99_s28 = int_to_ptr.vmem [resolvable:$true] %s98_s28  ;;  %s126_s15 = int_to_ptr.vmem [resolvable:$true] %s125_s15 }
  0x1d   :  { %s3788_s4 = scalar_lea.vmem %s99_s28, 32  ;;  %p3793_p11 = scmp.lt.s32.totalorder %s99_s28, %s99_s28 }
  0x1e   :  { %p3789_p10 = scmp.ne.s32.totalorder %s99_s28, %s3788_s4  ;;  %p3794_p12 = scmp.lt.s32.totalorder %s3788_s4, %s3788_s4 }
  0x20   :  { %p3795_p13 = por %p3794_p12, %p3793_p11 }
  0x22   :  { %p3796_p0 = pnand %p3795_p13, %p3789_p10 }
  0x24   :  { %3799 = shalt.err (!%p3796_p0)
}
  0x25   :  { %104 = dma.hbm_to_vmem [thread:$0]  %s4519_s9, 32, %s99_s28, [#allocation12], %s3956_s23, %s3956_s23, %s3957_s24  }
  0x26   :  { %s3808_s6 = scalar_lea.vmem %s126_s15, 16  ;;  %s3812_s16 = scalar_lea.vmem %s126_s15, 32 }
  0x27   :  { %p3809_p1 = scmp.ne.s32.totalorder %s126_s15, %s3808_s6  ;;  %p3813_p2 = scmp.lt.s32.totalorder %s126_s15, %s126_s15 }
  0x28   :  { %p3814_p3 = scmp.lt.s32.totalorder %s3812_s16, %s3808_s6 }
  0x2a   :  { %p3815_p4 = por %p3814_p3, %p3813_p2 }
  0x2c   :  { %p3816_p5 = pnand %p3815_p4, %p3809_p1 }
  0x2e   :  { %3819 = shalt.err (!%p3816_p5)
}
  0x2f   :  { %128 = dma.hbm_to_vmem [thread:$0]  %s4522_s12, 16, %s126_s15, [#allocation15]  }
  0x30   :  { %s3960_s22 = smov [#allocation2]   ;;  %s3961_s26 = smov [#allocation7]  }
  0x31   :  { %s34_s25 = sshll.u32 %s3960_s22, 4  ;;  %s60_s27 = sshll.u32 %s3961_s26, 4  ;;  %s35_s25 = int_to_ptr.vmem [resolvable:$true] %s34_s25  ;;  %s61_s27 = int_to_ptr.vmem [resolvable:$true] %s60_s27 }
  0x32   :  { %s3828_s29 = scalar_lea.vmem %s35_s25, 256  ;;  %p3833_p7 = scmp.lt.s32.totalorder %s35_s25, %s35_s25 }
  0x33   :  { %p3829_p6 = scmp.ne.s32.totalorder %s35_s25, %s3828_s29  ;;  %p3834_p8 = scmp.lt.s32.totalorder %s3828_s29, %s3828_s29 }
  0x35   :  { %p3835_p9 = por %p3834_p8, %p3833_p7 }
  0x37   :  { %p3836_p10 = pnand %p3835_p9, %p3829_p6 }
  0x39   :  { %3839 = shalt.err (!%p3836_p10)
}
  0x3a   :  { %40 = dma.hbm_to_vmem [thread:$0]  %s4512_s2, 256, %s35_s25, [#allocation3], %s3954_s18, %s3954_s18, %s3955_s19  }
  0x3b   :  { %s3848_s12 = scalar_lea.vmem %s61_s27, 512  ;;  %p3853_p12 = scmp.lt.s32.totalorder %s61_s27, %s61_s27 }
  0x3c   :  { %p3849_p11 = scmp.ne.s32.totalorder %s61_s27, %s3848_s12  ;;  %p3854_p13 = scmp.lt.s32.totalorder %s3848_s12, %s3848_s12 }
  0x3e   :  { %p3855_p0 = por %p3854_p13, %p3853_p12 }
  0x40   :  { %p3856_p1 = pnand %p3855_p0, %p3849_p11 }
  0x42   :  { %3859 = shalt.err (!%p3856_p1)
}
  0x43   :  { %s3962_s28 = smov 64   ;;  %s3963_s15 = smov 4  }
  0x44   :  { %66 = dma.hbm_to_vmem [thread:$0]  %s4515_s5, 512, %s61_s27, [#allocation6], %s3962_s28, %s3962_s28, %s3963_s15  }
  0x45   :  { %s3964_s17 = smov [#allocation10]  }
  0x46   :  { %s84_s6 = sshll.u32 %s3964_s17, 4  ;;  %s85_s6 = int_to_ptr.vmem [resolvable:$true] %s84_s6 }
  0x47   :  { %s3868_s16 = scalar_lea.vmem %s85_s6, 10240  ;;  %p3873_p3 = scmp.lt.s32.totalorder %s85_s6, %s85_s6 }
  0x48   :  { %p3869_p2 = scmp.ne.s32.totalorder %s85_s6, %s3868_s16  ;;  %p3874_p4 = scmp.lt.s32.totalorder %s3868_s16, %s3868_s16 }
  0x4a   :  { %p3875_p5 = por %p3874_p4, %p3873_p3 }
  0x4c   :  { %p3876_p6 = pnand %p3875_p5, %p3869_p2 }
  0x4e   :  { %3879 = shalt.err (!%p3876_p6)
}
  0x4f   :  { %s3965_s2 = smov 320   ;;  %s3966_s20 = smov 20  }
  0x50   :  { %90 = dma.hbm_to_vmem [thread:$0]  %s4517_s7, 10240, %s85_s6, [#allocation9], %s3965_s2, %s3965_s2, %s3966_s20  }
  0x51   :  { %s3967_s25 = smov [#allocation13]  }
  0x52   :  { %s110_s26 = sshll.u32 %s3967_s25, 4  ;;  %s111_s26 = int_to_ptr.vmem [resolvable:$true] %s110_s26 }
  0x53   :  { %s3888_s5 = scalar_lea.vmem %s111_s26, 8192  ;;  %p3893_p8 = scmp.lt.s32.totalorder %s111_s26, %s111_s26 }
  0x54   :  { %p3889_p7 = scmp.ne.s32.totalorder %s111_s26, %s3888_s5  ;;  %p3894_p9 = scmp.lt.s32.totalorder %s3888_s5, %s3888_s5 }
  0x56   :  { %p3895_p10 = por %p3894_p9, %p3893_p8 }
  0x58   :  { %p3896_p11 = pnand %p3895_p10, %p3889_p7 }
  0x5a   :  { %3899 = shalt.err (!%p3896_p11)
}
  0x5b   :  { %s3968_s27 = smov 256   ;;  %s3969_s24 = smov [#allocation16]  }
  0x5c   :  { %116 = dma.hbm_to_vmem [thread:$0]  %s4520_s10, 8192, %s111_s26, [#allocation12], %s3968_s27, %s3968_s27, %s3956_s23  }
  0x5d   :  { %s134_s7 = sshll.u32 %s3969_s24, 4  ;;  %s135_s7 = int_to_ptr.vmem [resolvable:$true] %s134_s7 }
  0x5e   :  { %s3908_s12 = scalar_lea.vmem %s135_s7, 2048  ;;  %p3913_p13 = scmp.lt.s32.totalorder %s135_s7, %s135_s7 }
  0x5f   :  { %p3909_p12 = scmp.ne.s32.totalorder %s135_s7, %s3908_s12  ;;  %p3914_p0 = scmp.lt.s32.totalorder %s3908_s12, %s3908_s12 }
  0x61   :  { %p3915_p1 = por %p3914_p0, %p3913_p13 }
  0x63   :  { %p3916_p2 = pnand %p3915_p1, %p3909_p12 }
  0x65   :  { %3919 = shalt.err (!%p3916_p2)
}
  0x66   :  { %140 = dma.hbm_to_vmem [thread:$0]  %s4523_s13, 2048, %s135_s7, [#allocation15], %s3954_s18, %s3954_s18, %s3955_s19  }
  0x67   :  { %3940 = dma.done.wait [#allocation3], 256  }
  0x68   :  { %3941 = vsyncadd [#allocation3], 4294967040 }
  0x69   :  { %3942 = dma.done.wait [#allocation6], 1536  }
  0x6a   :  { %3943 = vsyncadd [#allocation6], 4294965760 }
  0x6b   :  { %3944 = dma.done.wait [#allocation9], 10272  }
  0x6c   :  { %3945 = vsyncadd [#allocation9], 4294957024 }
  0x6d   :  { %3946 = dma.done.wait [#allocation12], 8224  }
  0x6e   :  { %3947 = vsyncadd [#allocation12], 4294959072 }
  0x6f   :  { %3948 = dma.done.wait [#allocation15], 2064  }
  0x70   :  { %3949 = vsyncadd [#allocation15], 4294965232  ;;  %v4095_v0 = vld [vmem:[%s4510_s0] sm:$0xff]  ;;  %v4100_v1 = vld [vmem:[%s4510_s0 + $0x8] sm:$0xff]  ;;  %v3970_v31 = vmov 0   ;;  %v3971_v37 = vmov 0.0  }
  0x71   :  { %v194_v2 = vmul.f32 %v4095_v0, %v4095_v0  ;;  %v3386_v3 = vld [vmem:[#allocation10 + $0x11c] ss:$20 sps:$4 sm:$0xff]   ;;  %v3388_v4 = vld [vmem:[#allocation10 + $0x118] ss:$20 sps:$4 sm:$0xff]   ;;  %v195_v6 = vmul.f32 %v4100_v1, %v4100_v1  ;;  %v3391_v7 = vld [vmem:[#allocation10 + $0x120] ss:$20 sps:$4 sm:$0xff]   ;;  %506 = vmatprep.mubr.bf16.mxu0 %v3970_v31  ;;  %549 = vmatprep.mubr.bf16.mxu1 %v3970_v31 }
  0x72   :  { %v3389_v5 = vld [vmem:[#allocation10 + $0x124] ss:$20 sps:$4 sm:$0xff]   ;;  %474 = vmatprep.subr.bf16.mxu0 %v3386_v3  ;;  %v3392_v8 = vld [vmem:[#allocation10 + $0xf4] ss:$20 sps:$4 sm:$0xff]   ;;  %v3395_v10 = vld [vmem:[#allocation10 + $0xfc] ss:$20 sps:$4 sm:$0xff]  }
  0x73   :  { %196 = vadd.xlane.f32.xlu0 %v194_v2  ;;  %475 = vmatpush1.bf16.msra.mxu0 %v3388_v4  ;;  %v3394_v9 = vld [vmem:[#allocation10 + $0xf0] ss:$20 sps:$4 sm:$0xff]   ;;  %v3397_v11 = vld [vmem:[#allocation10 + $0xf8] ss:$20 sps:$4 sm:$0xff]   ;;  %v3400_v13 = vld [vmem:[#allocation10 + $0xc8] ss:$20 sps:$4 sm:$0xff]  }
  0x74   :  { %517 = vmatprep.subr.bf16.mxu1 %v3389_v5  ;;  %476 = vmatprep.subr.bf16.mxu0 %v3392_v8  ;;  %v3398_v12 = vld [vmem:[#allocation10 + $0xcc] ss:$20 sps:$4 sm:$0xff]   ;;  %v3401_v14 = vld [vmem:[#allocation10 + $0xd4] ss:$20 sps:$4 sm:$0xff]   ;;  %v3403_v15 = vld [vmem:[#allocation10 + $0xd0] ss:$20 sps:$4 sm:$0xff]  }
  0x75   :  { %518 = vmatpush1.bf16.msra.mxu1 %v3391_v7  ;;  %v3404_v16 = vld [vmem:[#allocation10 + $0xa4] ss:$20 sps:$4 sm:$0xff]   ;;  %v3406_v17 = vld [vmem:[#allocation10 + $0xa0] ss:$20 sps:$4 sm:$0xff]   ;;  %v3409_v19 = vld [vmem:[#allocation10 + $0xa8] ss:$20 sps:$4 sm:$0xff]  }
  0x76   :  { %519 = vmatprep.subr.bf16.mxu1 %v3395_v10  ;;  %v3407_v18 = vld [vmem:[#allocation10 + $0xac] ss:$20 sps:$4 sm:$0xff]   ;;  %v3410_v20 = vld [vmem:[#allocation10 + $0x7c] ss:$20 sps:$4 sm:$0xff]   ;;  %v3413_v22 = vld [vmem:[#allocation10 + $0x84] ss:$20 sps:$4 sm:$0xff]  }
  0x77   :  { %198 = vadd.xlane.f32.xlu0 %v195_v6  ;;  %477 = vmatpush1.bf16.msra.mxu0 %v3394_v9  ;;  %v3412_v21 = vld [vmem:[#allocation10 + $0x78] ss:$20 sps:$4 sm:$0xff]   ;;  %v3415_v23 = vld [vmem:[#allocation10 + $0x80] ss:$20 sps:$4 sm:$0xff]   ;;  %v3419_v25 = vld [vmem:[#allocation10 + $0x5c] ss:$20 sps:$4 sm:$0xff]  }
  0x78   :  { %478 = vmatprep.subr.bf16.mxu0 %v3398_v12  ;;  %v3416_v24 = vld [vmem:[#allocation10 + $0x54] ss:$20 sps:$4 sm:$0xff]   ;;  %v3418_v26 = vld [vmem:[#allocation10 + $0x50] ss:$20 sps:$4 sm:$0xff]   ;;  %v3421_v27 = vld [vmem:[#allocation10 + $0x58] ss:$20 sps:$4 sm:$0xff]  }
  0x79   :  { %520 = vmatpush1.bf16.msra.mxu1 %v3397_v11  ;;  %v3422_v28 = vld [vmem:[#allocation10 + $0x2c] ss:$20 sps:$4 sm:$0xff]   ;;  %v3425_v29 = vld [vmem:[#allocation10 + $0x34] ss:$20 sps:$4 sm:$0xff]   ;;  %v3427_v32 = vld [vmem:[#allocation10 + $0x30] ss:$20 sps:$4 sm:$0xff]  }
  0x7a   :  { %521 = vmatprep.subr.bf16.mxu1 %v3401_v14  ;;  %v3424_v30 = vld [vmem:[#allocation10 + $0x28] ss:$20 sps:$4 sm:$0xff]   ;;  %v3428_v33 = vld [vmem:[#allocation10 + $0x4] ss:$20 sps:$4 sm:$0xff]   ;;  %v3431_v34 = vld [vmem:[#allocation10 + $0xc] ss:$20 sps:$4 sm:$0xff]  }
  0x7b   :  { %479 = vmatpush1.bf16.msra.mxu0 %v3400_v13  ;;  %v3430_v35 = vld [vmem:[#allocation10] ss:$20 sps:$4 sm:$0xff]   ;;  %v3433_v36 = vld [vmem:[#allocation10 + $0x8] ss:$20 sps:$4 sm:$0xff]   ;;  %vm3972_vm0 = vmmov 0   ;;  %vm675_vm1 = vcmask 523264  }
  0x7c   :  { %480 = vmatprep.subr.bf16.mxu0 %v3404_v16  ;;  %v2825_v47 = vld [vmem:[#allocation8] ss:$0 sm:$0xff]  ;;  %v3435_v53 = vld [vmem:[#allocation10 + $0x100] ss:$20 sps:$4 sm:$0xff]   ;;  %v3436_v54 = vld [vmem:[#allocation10 + $0xd8] ss:$20 sps:$4 sm:$0xff]  }
  0x7d   :  { %522 = vmatpush1.bf16.msra.mxu1 %v3403_v15  ;;  %v3434_v51 = vld [vmem:[#allocation10 + $0x128] ss:$20 sps:$4 sm:$0xff]   ;;  %v3437_v55 = vld [vmem:[#allocation10 + $0xb0] ss:$20 sps:$4 sm:$0xff]   ;;  %v3439_v57 = vld [vmem:[#allocation10 + $0x60] ss:$20 sps:$4 sm:$0xff]  }
  0x7e   :  { %523 = vmatprep.subr.bf16.mxu1 %v3407_v18  ;;  %v3438_v56 = vld [vmem:[#allocation10 + $0x88] ss:$20 sps:$4 sm:$0xff]   ;;  %v3440_v58 = vld [vmem:[#allocation10 + $0x38] ss:$20 sps:$4 sm:$0xff]   ;;  %v3441_v59 = vld [vmem:[#allocation10 + $0x10] ss:$20 sps:$4 sm:$0xff]  }
  0x7f   :  { %481 = vmatpush1.bf16.msra.mxu0 %v3406_v17  ;;  %v4126_v61 = vld [vmem:[#allocation2] sm:$0xff]  ;;  %v4139_v3 = vld [vmem:[#allocation2 + $0x8] sm:$0xff]  ;;  %v4150_v15 = vld [vmem:[#allocation5 + $0x28] sm:$0xff] }
  0x80   :  { %482 = vmatprep.subr.bf16.mxu0 %v3410_v20  ;;  %v4131_v62 = vld [vmem:[%s4511_s1] sm:$0xff]  ;;  %v4146_v10 = vld [vmem:[#allocation5 + $0x38] sm:$0xff]  ;;  %v4153_v16 = vld [vmem:[#allocation5 + $0x20] sm:$0xff] }
  0x81   :  { %524 = vmatpush1.bf16.msra.mxu1 %v3409_v19  ;;  %v4144_v9 = vld [vmem:[#allocation5 + $0x30] sm:$0xff] }
  0x82   :  { %525 = vmatprep.subr.bf16.mxu1 %v3413_v22  ;;  %v4157_v22 = vld [vmem:[#allocation5 + $0x18] sm:$0xff] }
  0x83   :  { %483 = vmatpush1.bf16.msra.mxu0 %v3412_v21 }
  0x84   :  { %484 = vmatprep.subr.bf16.mxu0 %v3416_v24 }
  0x85   :  { %526 = vmatpush1.bf16.msra.mxu1 %v3415_v23  ;;  %v4160_v23 = vld [vmem:[#allocation5 + $0x10] sm:$0xff] }
  0x86   :  { %527 = vmatprep.subr.bf16.mxu1 %v3419_v25 }
  0x87   :  { %485 = vmatpush1.bf16.msra.mxu0 %v3418_v26 }
  0x88   :  { %486 = vmatprep.subr.bf16.mxu0 %v3422_v28 }
  0x89   :  { %528 = vmatpush1.bf16.msra.mxu1 %v3421_v27  ;;  %v4164_v27 = vld [vmem:[#allocation5 + $0x8] sm:$0xff] }
  0x8a   :  { %529 = vmatprep.subr.bf16.mxu1 %v3425_v29 }
  0x8b   :  { %487 = vmatpush1.bf16.msra.mxu0 %v3424_v30  ;;  %v4166_v30 = vld [vmem:[#allocation5] sm:$0xff] }
  0x8c   :  { %488 = vmatprep.subr.bf16.mxu0 %v3428_v33 }
  0x8d   :  { %530 = vmatpush1.bf16.msra.mxu1 %v3427_v32 }
  0x8e   :  { %531 = vmatprep.subr.bf16.mxu1 %v3431_v34 }
  0x8f   :  { %489 = vmatpush1.bf16.msra.mxu0 %v3430_v35 }
  0x90   :  { %3212 = vmatprep.subr.bf16.mxu0 %v3971_v37 }
  0x91   :  { %532 = vmatpush1.bf16.msra.mxu1 %v3433_v36 }
  0x92   :  { %3232 = vmatprep.subr.bf16.mxu1 %v3971_v37 }
  0xfc   :  { %v197_v38 = vpop.xlane.xlu0 %196 }
  0xfd   :  { %v201_v39 = vmul.f32 0.0078125, %v197_v38 }
  0xff   :  { %v203_v40 = vadd.f32 1e-05, %v201_v39 }
 0x100   :  { %v199_v41 = vpop.xlane.xlu0 %198 }
 0x101   :  { %3670 = vrsqrt.f32 %v203_v40  ;;  %v202_v42 = vmul.f32 0.0078125, %v199_v41 }
 0x103   :  { %v204_v43 = vadd.f32 1e-05, %v202_v42 }
 0x105   :  { %3672 = vrsqrt.f32 %v204_v43 }
 0x10e   :  { %v3671_v44 = vpop.eup %3670 }
 0x10f   :  { %v207_v45 = vmul.f32 %v3671_v44, %v4095_v0 }
 0x111   :  { %v215_v49 = vmul.f32 %v2825_v47, %v207_v45 }
 0x112   :  { %v3673_v46 = vpop.eup %3672 }
 0x113   :  { %v208_v48 = vmul.f32 %v3673_v46, %v4100_v1  ;;  %v4137_v1 = vld [vmem:[%s4511_s1 + $0x8] sm:$0xff] }
 0x115   :  { %v216_v50 = vmul.f32 %v2825_v47, %v208_v48 }
 0x117   :  { %v265_v52 = vpack.c.bf16 %v216_v50, %v215_v49 }
 0x119   :  { %507 = vmatmul.mubr.bf16.vlgmr.msra.gmra.mxu0 %v265_v52  ;;  %550 = vmatmul.mubr.bf16.vlgmr.msra.gmra.mxu1 %v265_v52 }
 0x11a   :  { %3213 = vmatpush3.bf16.msra.mxu0 %v3434_v51  ;;  %3228 = vmatprep.mubr.msk.bf16.mxu0 %vm3972_vm0, %v3971_v37 }
 0x11b   :  { %3214 = vmatprep.subr.bf16.mxu0 %v3971_v37  ;;  %3240 = vmatprep.mubr.msk.bf16.mxu1 %vm3972_vm0, %v3971_v37 }
 0x11e   :  { %3215 = vmatpush3.bf16.msra.mxu0 %v3435_v53 }
 0x11f   :  { %3216 = vmatprep.subr.bf16.mxu0 %v3971_v37 }
 0x122   :  { %3217 = vmatpush3.bf16.msra.mxu0 %v3436_v54 }
 0x123   :  { %3218 = vmatprep.subr.bf16.mxu0 %v3971_v37 }
 0x126   :  { %3219 = vmatpush3.bf16.msra.mxu0 %v3437_v55 }
 0x127   :  { %3220 = vmatprep.subr.bf16.mxu0 %v3971_v37 }
 0x12a   :  { %3221 = vmatpush3.bf16.msra.mxu0 %v3438_v56 }
 0x12b   :  { %3222 = vmatprep.subr.bf16.mxu0 %v3971_v37 }
 0x12e   :  { %3223 = vmatpush3.bf16.msra.mxu0 %v3439_v57 }
 0x12f   :  { %3224 = vmatprep.subr.bf16.mxu0 %v3971_v37 }
 0x132   :  { %3225 = vmatpush3.bf16.msra.mxu0 %v3440_v58 }
 0x133   :  { %3226 = vmatprep.subr.bf16.mxu0 %v3971_v37 }
 0x136   :  { %3227 = vmatpush3.bf16.msra.mxu0 %v3441_v59  ;;  %v4198_v59 = vld [vmem:[%s4513_s3] sm:$0xff] }
 0x137   :  { %3268 = vmatprep.subr.bf16.mxu0 %v3971_v37 }
 0x139   :  { %3229 = vmatmul.mubr.bf16.vlgmr.msra.gmra.mxu0 %v265_v52 }
 0x13a   :  { %3284 = vmatprep.mubr.msk.bf16.mxu0 %vm3972_vm0, %v3971_v37 }
 0x1d9   :  { %v551_v60 = vpop.f32.mrf.mxu1  ;;  %v508_v18 = vpop.f32.mrf.mxu0 }
 0x1da   :  { %v607_v4 = vmul.f32 %v551_v60, %v4131_v62  ;;  %v601_v55 = vmul.f32 %v508_v18, %v4131_v62 }
 0x1db   :  { %v553_v63 = vpop.f32.mrf.mxu1  ;;  %v510_v21 = vpop.f32.mrf.mxu0 }
 0x1dc   :  { %v609_v0 = vmul.f32 %v553_v63, %v4126_v61  ;;  %v603_v48 = vmul.f32 %v510_v21, %v4126_v61 }
 0x1dd   :  { %v555_v2 = vpop.f32.mrf.mxu1  ;;  %v512_v25 = vpop.f32.mrf.mxu0 }
 0x1de   :  { %v611_v6 = vadd.f32 %v609_v0, %v607_v4  ;;  %v608_v7 = vmul.f32 %v555_v2, %v4137_v1  ;;  %v602_v49 = vmul.f32 %v512_v25, %v4137_v1  ;;  %v605_v57 = vadd.f32 %v603_v48, %v601_v55  ;;  %v4204_v2 = vld [vmem:[%s4513_s3 + $0x8] sm:$0xff]  ;;  %v3453_v48 = vld [vmem:[%s4518_s8] sm:$0xff]  }
 0x1df   :  { %v557_v5 = vpop.f32.mrf.mxu1  ;;  %v514_v29 = vpop.f32.mrf.mxu0  ;;  %v3456_v55 = vld [vmem:[#allocation13 + $0xe4] ss:$16 sps:$4 sm:$0xff]  }
 0x1e0   :  { %v610_v8 = vmul.f32 %v557_v5, %v4139_v3  ;;  %v619_v12 = vmul.f32 %v611_v6, %v4144_v9  ;;  %v617_v19 = vmul.f32 %v611_v6, %v4153_v16  ;;  %v615_v26 = vmul.f32 %v611_v6, %v4160_v23 }
 0x1e1   :  { %v613_v34 = vmul.f32 %v611_v6, %v4166_v30  ;;  %v604_v36 = vmul.f32 %v514_v29, %v4139_v3  ;;  %v3446_v29 = vld [vmem:[%s4518_s8 + $0x38] sm:$0xff]  }
 0x1e2   :  { %v612_v11 = vadd.f32 %v610_v8, %v608_v7  ;;  %3269 = vmatpush3.bf16.msra.mxu0 %v3446_v29  ;;  %v3474_v29 = vld [vmem:[#allocation13 + $0x84] ss:$16 sps:$4 sm:$0xff]  }
 0x1e3   :  { %v606_v56 = vadd.f32 %v604_v36, %v602_v49  ;;  %3270 = vmatprep.subr.bf16.mxu0 %v3971_v37  ;;  %v3451_v36 = vld [vmem:[%s4518_s8 + $0x10] sm:$0xff]  }
 0x1e4   :  { %v620_v13 = vmul.f32 %v612_v11, %v4146_v10  ;;  %v618_v17 = vmul.f32 %v612_v11, %v4150_v15  ;;  %v616_v24 = vmul.f32 %v612_v11, %v4157_v22  ;;  %v614_v32 = vmul.f32 %v612_v11, %v4164_v27  ;;  %v4209_v11 = vld [vmem:[#allocation7 + $0x18] sm:$0xff]  }
 0x1e5   :  { %v629_v58 = vpack.c.bf16 %v606_v56, %v605_v57  ;;  %v3457_v56 = vld [vmem:[#allocation13 + $0xe8] ss:$16 sps:$4 sm:$0xff]   ;;  %v3459_v57 = vld [vmem:[#allocation13 + $0xec] ss:$16 sps:$4 sm:$0xff]  }
 0x1e6   :  { %v633_v14 = vpack.c.bf16 %v620_v13, %v619_v12  ;;  %v632_v20 = vpack.c.bf16 %v618_v17, %v617_v19  ;;  %v631_v28 = vpack.c.bf16 %v616_v24, %v615_v26  ;;  %v630_v38 = vpack.c.bf16 %v614_v32, %v613_v34  ;;  %v4212_v12 = vld [vmem:[#allocation7 + $0x10] sm:$0xff]   ;;  %v4216_v13 = vld [vmem:[#allocation7 + $0x8] sm:$0xff]   ;;  %v3447_v32 = vld [vmem:[%s4518_s8 + $0x30] sm:$0xff]  }
 0x1e7   :  { %3271 = vmatpush3.bf16.msra.mxu0 %v3447_v32  ;;  %v3449_v34 = vld [vmem:[%s4518_s8 + $0x20] sm:$0xff]  }
 0x1e8   :  { %3233 = vmatpush3.bf16.xpose.msra.mxu1 %v633_v14  ;;  %v4220_v14 = vld [vmem:[#allocation7] sm:$0xff]   ;;  %3272 = vmatprep.subr.bf16.mxu0 %v3971_v37 }
 0x1e9   :  { %3234 = vmatprep.subr.bf16.mxu1 %v3971_v37  ;;  %v3477_v32 = vld [vmem:[#allocation13 + $0x8c] ss:$16 sps:$4 sm:$0xff]  }
 0x1f0   :  { %3235 = vmatpush3.bf16.xpose.msra.mxu1 %v632_v20 }
 0x1f1   :  { %3236 = vmatprep.subr.bf16.mxu1 %v3971_v37 }
 0x1f8   :  { %3237 = vmatpush3.bf16.xpose.msra.mxu1 %v631_v28 }
 0x1f9   :  { %v594_v33 = vpop.f32.mrf.mxu0  ;;  %3238 = vmatprep.subr.bf16.mxu1 %v3971_v37 }
 0x1fa   :  { %v4173_v39 = vmul.f32 %v594_v33, %v4166_v30  ;;  %v4176_v40 = vmul.f32 %v594_v33, %v4160_v23  ;;  %v625_v41 = vmul.f32 %v594_v33, %v4153_v16  ;;  %v627_v42 = vmul.f32 %v594_v33, %v4144_v9  ;;  %v3448_v33 = vld [vmem:[%s4518_s8 + $0x28] sm:$0xff]  }
 0x1fb   :  { %v3230_v35 = vpop.f32.mrf.mxu0  ;;  %3273 = vmatpush3.bf16.msra.mxu0 %v3448_v33  ;;  %v3472_v33 = vld [vmem:[#allocation13 + $0x80] ss:$16 sps:$4 sm:$0xff]  }
 0x1fc   :  { %3274 = vmatprep.subr.bf16.mxu0 %v3971_v37  ;;  %v3450_v35 = vld [vmem:[%s4518_s8 + $0x18] sm:$0xff]  }
 0x1fd   :  { %v597_v43 = vpop.f32.mrf.mxu0 }
 0x1fe   :  { %v4181_v44 = vmul.f32 %v597_v43, %v4164_v27  ;;  %v624_v45 = vmul.f32 %v597_v43, %v4157_v22  ;;  %v626_v46 = vmul.f32 %v597_v43, %v4150_v15  ;;  %v628_v47 = vmul.f32 %v597_v43, %v4146_v10 }
 0x1ff   :  { %v3231_v50 = vpop.f32.mrf.mxu0  ;;  %3275 = vmatpush3.bf16.msra.mxu0 %v3449_v34  ;;  %v3475_v34 = vld [vmem:[#allocation13 + $0x88] ss:$16 sps:$4 sm:$0xff]  }
 0x200   :  { %3239 = vmatpush3.bf16.xpose.msra.mxu1 %v630_v38  ;;  %v765_v51 = vpack.c.bf16 %v628_v47, %v627_v42  ;;  %v764_v52 = vpack.c.bf16 %v626_v46, %v625_v41  ;;  %v763_v53 = vpack.c.bf16 %v624_v45, %v4176_v40  ;;  %v762_v54 = vpack.c.bf16 %v4181_v44, %v4173_v39  ;;  %v3452_v47 = vld [vmem:[%s4518_s8 + $0x8] sm:$0xff]  }
 0x201   :  { %3244 = vmatprep.subr.bf16.mxu1 %v3971_v37  ;;  %3276 = vmatprep.subr.bf16.mxu0 %v3971_v37 }
 0x203   :  { %3277 = vmatpush3.bf16.msra.mxu0 %v3450_v35  ;;  %v3480_v35 = vld [vmem:[#allocation13 + $0x64] ss:$16 sps:$4 sm:$0xff]  }
 0x204   :  { %3278 = vmatprep.subr.bf16.mxu0 %v3971_v37 }
 0x207   :  { %3241 = vmatmul.mubr.bf16.vlgmr.msra.gmra.mxu1 %v629_v58  ;;  %3279 = vmatpush3.bf16.msra.mxu0 %v3451_v36  ;;  %v3483_v36 = vld [vmem:[#allocation13 + $0x6c] ss:$16 sps:$4 sm:$0xff]  }
 0x208   :  { %3252 = vmatprep.mubr.msk.bf16.mxu1 %vm3972_vm0, %v3971_v37  ;;  %3245 = vmatpush3.bf16.msra.mxu1 %v4209_v11 }
 0x209   :  { %3246 = vmatprep.subr.bf16.mxu1 %v3971_v37  ;;  %3280 = vmatprep.subr.bf16.mxu0 %v3971_v37 }
 0x20b   :  { %3281 = vmatpush3.bf16.msra.mxu0 %v3452_v47  ;;  %v3493_v47 = vld [vmem:[#allocation13 + $0x28] ss:$16 sps:$4 sm:$0xff]  }
 0x20c   :  { %3247 = vmatpush3.bf16.msra.mxu1 %v4212_v12  ;;  %3282 = vmatprep.subr.bf16.mxu0 %v3971_v37 }
 0x20d   :  { %3248 = vmatprep.subr.bf16.mxu1 %v3971_v37 }
 0x20f   :  { %3283 = vmatpush3.bf16.msra.mxu0 %v3453_v48  ;;  %v3498_v48 = vld [vmem:[#allocation13 + $0x4] ss:$16 sps:$4 sm:$0xff]  }
 0x210   :  { %3249 = vmatpush3.bf16.msra.mxu1 %v4216_v13  ;;  %1177 = vmatprep.subr.bf16.mxu0 %v3459_v57 }
 0x211   :  { %3250 = vmatprep.subr.bf16.mxu1 %v3971_v37 }
 0x214   :  { %3251 = vmatpush3.bf16.msra.mxu1 %v4220_v14 }
 0x215   :  { %3256 = vmatprep.subr.bf16.mxu1 %v3971_v37 }
 0x2c7   :  { %v668_v60 = vpop.f32.mrf.mxu1 }
 0x2c8   :  { %v669_v63 = vadd.f32 %v668_v60, %v4198_v59  ;;  %v3738_v60 = vld [vmem:[%s4510_s0] sm:$0xff] }
 0x2c9   :  { %v3242_v0 = vpop.f32.mrf.mxu1 }
 0x2ca   :  { %v676_v4 = vsel %vm675_vm1, %v669_v63, -inf }
 0x2cb   :  { %677 = vmax.xlane.f32.xlu1 %v676_v4  ;;  %v671_v5 = vpop.f32.mrf.mxu1 }
 0x2cc   :  { %v672_v6 = vadd.f32 %v671_v5, %v4204_v2 }
 0x2cd   :  { %v3243_v7 = vpop.f32.mrf.mxu1 }
 0x2ce   :  { %v679_v8 = vsel %vm675_vm1, %v672_v6, -inf }
 0x2cf   :  { %680 = vmax.xlane.f32.xlu1 %v679_v8 }
 0x354   :  { %v678_v17 = vpop.xlane.xlu1 %677 }
 0x355   :  { %v682_v18 = vsub.f32 %v669_v63, %v678_v17 }
 0x357   :  { %v684_v19 = vmul.f32 1.442695, %v682_v18  ;;  %v3462_v18 = vld [vmem:[#allocation13 + $0xc4] ss:$16 sps:$4 sm:$0xff]  }
 0x358   :  { %v681_v20 = vpop.xlane.xlu1 %680 }
 0x359   :  { %v683_v21 = vsub.f32 %v672_v6, %v681_v20  ;;  %3674 = vpow2.f32 %v684_v19  ;;  %v3739_v6 = vld [vmem:[%s4510_s0 + $0x8] sm:$0xff]  ;;  %v3465_v19 = vld [vmem:[#allocation13 + $0xcc] ss:$16 sps:$4 sm:$0xff]   ;;  %v3460_v20 = vld [vmem:[#allocation13 + $0xc0] ss:$16 sps:$4 sm:$0xff]  }
 0x35b   :  { %v686_v24 = vmul.f32 1.442695, %v683_v21  ;;  %v3463_v21 = vld [vmem:[#allocation13 + $0xc8] ss:$16 sps:$4 sm:$0xff]  }
 0x35d   :  { %3676 = vpow2.f32 %v686_v24  ;;  %v3468_v24 = vld [vmem:[#allocation13 + $0xa4] ss:$16 sps:$4 sm:$0xff]  }
 0x366   :  { %v3675_v25 = vpop.eup %3674 }
 0x36a   :  { %v3677_v26 = vpop.eup %3676 }
 0x36b   :  { %v688_v28 = vpack.c.bf16 %v3677_v26, %v3675_v25 }
 0x36d   :  { %3253 = vmatmul.mubr.msk.bf16.vlgmr.msra.gmra.mxu1 %vm675_vm1, %v688_v28  ;;  %v3469_v28 = vld [vmem:[#allocation13 + $0xa8] ss:$16 sps:$4 sm:$0xff]  }
 0x36e   :  { %3257 = vmatpush3.bf16.msra.mxu1 %v765_v51  ;;  %3264 = vmatprep.mubr.msk.bf16.mxu1 %vm3972_vm0, %v3971_v37 }
 0x36f   :  { %3258 = vmatprep.subr.bf16.mxu1 %v3971_v37 }
 0x372   :  { %3259 = vmatpush3.bf16.msra.mxu1 %v764_v52 }
 0x373   :  { %3260 = vmatprep.subr.bf16.mxu1 %v3971_v37 }
 0x376   :  { %3261 = vmatpush3.bf16.msra.mxu1 %v763_v53 }
 0x377   :  { %3262 = vmatprep.subr.bf16.mxu1 %v3971_v37 }
 0x37a   :  { %3263 = vmatpush3.bf16.msra.mxu1 %v762_v54  ;;  %v3454_v54 = vld [vmem:[#allocation13 + $0xe0] ss:$16 sps:$4 sm:$0xff]  }
 0x37b   :  { %1134 = vmatprep.subr.bf16.mxu1 %v3456_v55 }
 0x42d   :  { %v750_v38 = vpop.f32.mrf.mxu1 }
 0x42e   :  { %3678 = vrcp.f32 %v750_v38  ;;  %v3478_v38 = vld [vmem:[#allocation13 + $0x60] ss:$16 sps:$4 sm:$0xff]  }
 0x42f   :  { %v3254_v39 = vpop.f32.mrf.mxu1 }
 0x430   :  { %v3481_v39 = vld [vmem:[#allocation13 + $0x68] ss:$16 sps:$4 sm:$0xff]  }
 0x431   :  { %v753_v40 = vpop.f32.mrf.mxu1 }
 0x432   :  { %3680 = vrcp.f32 %v753_v40  ;;  %v3486_v40 = vld [vmem:[#allocation13 + $0x44] ss:$16 sps:$4 sm:$0xff]  }
 0x433   :  { %v3255_v41 = vpop.f32.mrf.mxu1 }
 0x434   :  { %v3489_v41 = vld [vmem:[#allocation13 + $0x4c] ss:$16 sps:$4 sm:$0xff]  }
 0x43b   :  { %v3679_v42 = vpop.eup %3678 }
 0x43c   :  { %v759_v44 = vmul.f32 %v3679_v42, %v3675_v25  ;;  %v3471_v25 = vld [vmem:[#allocation13 + $0xac] ss:$16 sps:$4 sm:$0xff]   ;;  %v3484_v42 = vld [vmem:[#allocation13 + $0x40] ss:$16 sps:$4 sm:$0xff]  }
 0x43f   :  { %v3681_v43 = vpop.eup %3680 }
 0x440   :  { %v760_v45 = vmul.f32 %v3681_v43, %v3677_v26  ;;  %v3466_v26 = vld [vmem:[#allocation13 + $0xa0] ss:$16 sps:$4 sm:$0xff]   ;;  %v3487_v43 = vld [vmem:[#allocation13 + $0x48] ss:$16 sps:$4 sm:$0xff]  }
 0x442   :  { %v761_v46 = vpack.c.bf16 %v760_v45, %v759_v44  ;;  %v3492_v44 = vld [vmem:[#allocation13 + $0x24] ss:$16 sps:$4 sm:$0xff]   ;;  %v3495_v45 = vld [vmem:[#allocation13 + $0x2c] ss:$16 sps:$4 sm:$0xff]  }
 0x444   :  { %3265 = vmatmul.mubr.msk.bf16.vlgmr.msra.gmra.mxu1 %vm675_vm1, %v761_v46  ;;  %v3490_v46 = vld [vmem:[#allocation13 + $0x20] ss:$16 sps:$4 sm:$0xff]  }
 0x445   :  { %1166 = vmatprep.mubr.bf16.mxu1 %v3970_v31  ;;  %1135 = vmatpush1.bf16.msra.mxu1 %v3454_v54 }
 0x446   :  { %1136 = vmatprep.subr.bf16.mxu1 %v3462_v18  ;;  %v3502_v18 = vld [vmem:[%s4521_s11 + $0x78] sm:$0xff]  }
 0x449   :  { %1137 = vmatpush1.bf16.msra.mxu1 %v3460_v20  ;;  %v3504_v20 = vld [vmem:[%s4521_s11 + $0x70] sm:$0xff]  }
 0x44a   :  { %1138 = vmatprep.subr.bf16.mxu1 %v3468_v24  ;;  %v3506_v24 = vld [vmem:[%s4521_s11 + $0x68] sm:$0xff]  }
 0x44d   :  { %1139 = vmatpush1.bf16.msra.mxu1 %v3466_v26  ;;  %v3508_v26 = vld [vmem:[%s4521_s11 + $0x60] sm:$0xff]  }
 0x44e   :  { %1140 = vmatprep.subr.bf16.mxu1 %v3474_v29  ;;  %v3510_v29 = vld [vmem:[%s4521_s11 + $0x58] sm:$0xff]  }
 0x451   :  { %1141 = vmatpush1.bf16.msra.mxu1 %v3472_v33  ;;  %v3512_v33 = vld [vmem:[%s4521_s11 + $0x50] sm:$0xff]  }
 0x452   :  { %1142 = vmatprep.subr.bf16.mxu1 %v3480_v35  ;;  %v3514_v35 = vld [vmem:[%s4521_s11 + $0x48] sm:$0xff]  }
 0x455   :  { %1143 = vmatpush1.bf16.msra.mxu1 %v3478_v38  ;;  %v3516_v38 = vld [vmem:[%s4521_s11 + $0x40] sm:$0xff]  }
 0x456   :  { %1144 = vmatprep.subr.bf16.mxu1 %v3486_v40 }
 0x459   :  { %1145 = vmatpush1.bf16.msra.mxu1 %v3484_v42 }
 0x45a   :  { %1146 = vmatprep.subr.bf16.mxu1 %v3492_v44 }
 0x45d   :  { %1147 = vmatpush1.bf16.msra.mxu1 %v3490_v46 }
 0x45e   :  { %1148 = vmatprep.subr.bf16.mxu1 %v3498_v48 }
 0x504   :  { %v803_v49 = vpop.f32.mrf.mxu1 }
 0x506   :  { %v3266_v50 = vpop.f32.mrf.mxu1 }
 0x507   :  { %v3496_v50 = vld [vmem:[#allocation13] ss:$16 sps:$4 sm:$0xff]  }
 0x508   :  { %v806_v51 = vpop.f32.mrf.mxu1  ;;  %1149 = vmatpush1.bf16.msra.mxu1 %v3496_v50 }
 0x509   :  { %v826_v52 = vpack.c.bf16 %v806_v51, %v803_v49  ;;  %v3501_v49 = vld [vmem:[#allocation13 + $0xc] ss:$16 sps:$4 sm:$0xff]   ;;  %v3499_v51 = vld [vmem:[#allocation13 + $0x8] ss:$16 sps:$4 sm:$0xff]   ;;  %3135 = vmatprep.subr.bf16.mxu1 %v3502_v18 }
 0x50a   :  { %v3267_v53 = vpop.f32.mrf.mxu1 }
 0x50b   :  { %3285 = vmatmul.mubr.bf16.vlgmr.msra.gmra.mxu0 %v826_v52 }
 0x50c   :  { %1209 = vmatprep.mubr.bf16.mxu0 %v3970_v31  ;;  %1178 = vmatpush1.bf16.msra.mxu0 %v3457_v56 }
 0x50d   :  { %1179 = vmatprep.subr.bf16.mxu0 %v3465_v19  ;;  %v3503_v19 = vld [vmem:[%s4521_s11 + $0x38] sm:$0xff]  }
 0x510   :  { %1180 = vmatpush1.bf16.msra.mxu0 %v3463_v21  ;;  %v3505_v21 = vld [vmem:[%s4521_s11 + $0x30] sm:$0xff]  }
 0x511   :  { %1181 = vmatprep.subr.bf16.mxu0 %v3471_v25  ;;  %v3507_v25 = vld [vmem:[%s4521_s11 + $0x28] sm:$0xff]  }
 0x514   :  { %1182 = vmatpush1.bf16.msra.mxu0 %v3469_v28  ;;  %v3509_v28 = vld [vmem:[%s4521_s11 + $0x20] sm:$0xff]  }
 0x515   :  { %1183 = vmatprep.subr.bf16.mxu0 %v3477_v32  ;;  %v3511_v32 = vld [vmem:[%s4521_s11 + $0x18] sm:$0xff]  }
 0x518   :  { %1184 = vmatpush1.bf16.msra.mxu0 %v3475_v34  ;;  %v3513_v34 = vld [vmem:[%s4521_s11 + $0x10] sm:$0xff]  }
 0x519   :  { %1185 = vmatprep.subr.bf16.mxu0 %v3483_v36  ;;  %v3515_v36 = vld [vmem:[%s4521_s11 + $0x8] sm:$0xff]  }
 0x51c   :  { %1186 = vmatpush1.bf16.msra.mxu0 %v3481_v39  ;;  %v3517_v39 = vld [vmem:[%s4521_s11] sm:$0xff]  }
 0x51d   :  { %1187 = vmatprep.subr.bf16.mxu0 %v3489_v41 }
 0x520   :  { %1188 = vmatpush1.bf16.msra.mxu0 %v3487_v43 }
 0x521   :  { %1189 = vmatprep.subr.bf16.mxu0 %v3495_v45 }
 0x524   :  { %1190 = vmatpush1.bf16.msra.mxu0 %v3493_v47 }
 0x525   :  { %1191 = vmatprep.subr.bf16.mxu0 %v3501_v49 }
 0x528   :  { %1192 = vmatpush1.bf16.msra.mxu0 %v3499_v51 }
 0x5cb   :  { %v909_v58 = vpop.f32.mrf.mxu0 }
 0x5cc   :  { %v4268_v63 = vadd.f32 %v3738_v60, %v909_v58 }
 0x5cd   :  { %v3286_v0 = vpop.f32.mrf.mxu0 }
 0x5ce   :  { %v919_v4 = vmul.f32 %v4268_v63, %v4268_v63 }
 0x5cf   :  { %v912_v5 = vpop.f32.mrf.mxu0 }
 0x5d0   :  { %v4275_v7 = vadd.f32 %v3739_v6, %v912_v5  ;;  %921 = vadd.xlane.f32.xlu0 %v919_v4  ;;  %v2880_v4 = vld [vmem:[#allocation11] ss:$0 sm:$0xff] }
 0x5d1   :  { %v3287_v8 = vpop.f32.mrf.mxu0 }
 0x5d2   :  { %v920_v17 = vmul.f32 %v4275_v7, %v4275_v7 }
 0x5d4   :  { %923 = vadd.xlane.f32.xlu1 %v920_v17 }
 0x659   :  { %v922_v52 = vpop.xlane.xlu0 %921 }
 0x65a   :  { %v925_v53 = vmul.f32 0.0078125, %v922_v52 }
 0x65c   :  { %v927_v54 = vadd.f32 1e-05, %v925_v53 }
 0x65d   :  { %v924_v55 = vpop.xlane.xlu1 %923 }
 0x65e   :  { %3682 = vrsqrt.f32 %v927_v54  ;;  %v926_v56 = vmul.f32 0.0078125, %v924_v55 }
 0x660   :  { %v928_v57 = vadd.f32 1e-05, %v926_v56 }
 0x662   :  { %3684 = vrsqrt.f32 %v928_v57 }
 0x66b   :  { %v3683_v58 = vpop.eup %3682 }
 0x66c   :  { %v931_v60 = vmul.f32 %v3683_v58, %v4268_v63 }
 0x66e   :  { %v939_v6 = vmul.f32 %v2880_v4, %v931_v60 }
 0x66f   :  { %v3685_v0 = vpop.eup %3684 }
 0x670   :  { %v932_v5 = vmul.f32 %v3685_v0, %v4275_v7 }
 0x672   :  { %v940_v8 = vmul.f32 %v2880_v4, %v932_v5 }
 0x674   :  { %v973_v17 = vpack.c.bf16 %v940_v8, %v939_v6 }
 0x676   :  { %1167 = vmatmul.mubr.bf16.vlgmr.msra.gmra.mxu1 %v973_v17  ;;  %1210 = vmatmul.mubr.bf16.vlgmr.msra.gmra.mxu0 %v973_v17 }
 0x677   :  { %1739 = vmatprep.mubr.bf16.mxu0 %v3970_v31  ;;  %3136 = vmatpush3.bf16.msra.mxu1 %v3503_v19 }
 0x678   :  { %3137 = vmatprep.subr.bf16.mxu1 %v3504_v20 }
 0x67b   :  { %3138 = vmatpush3.bf16.msra.mxu1 %v3505_v21 }
 0x67c   :  { %3139 = vmatprep.subr.bf16.mxu1 %v3506_v24 }
 0x67f   :  { %3140 = vmatpush3.bf16.msra.mxu1 %v3507_v25 }
 0x680   :  { %3141 = vmatprep.subr.bf16.mxu1 %v3508_v26 }
 0x683   :  { %3142 = vmatpush3.bf16.msra.mxu1 %v3509_v28 }
 0x684   :  { %3143 = vmatprep.subr.bf16.mxu1 %v3510_v29  ;;  %v3518_v29 = vld [vmem:[#allocation10 + $0x258] ss:$20 sps:$4 sm:$0xff]  }
 0x687   :  { %3144 = vmatpush3.bf16.msra.mxu1 %v3511_v32  ;;  %v3520_v32 = vld [vmem:[#allocation10 + $0x25c] ss:$20 sps:$4 sm:$0xff]  }
 0x688   :  { %3145 = vmatprep.subr.bf16.mxu1 %v3512_v33  ;;  %v3521_v33 = vld [vmem:[#allocation10 + $0x260] ss:$20 sps:$4 sm:$0xff]   ;;  %1707 = vmatprep.subr.bf16.mxu0 %v3520_v32 }
 0x689   :  { %1708 = vmatpush1.bf16.msra.mxu0 %v3518_v29 }
 0x68b   :  { %3146 = vmatpush3.bf16.msra.mxu1 %v3513_v34  ;;  %v3523_v34 = vld [vmem:[#allocation10 + $0x264] ss:$20 sps:$4 sm:$0xff]  }
 0x68c   :  { %3147 = vmatprep.subr.bf16.mxu1 %v3514_v35  ;;  %v3526_v35 = vld [vmem:[#allocation10 + $0x234] ss:$20 sps:$4 sm:$0xff]  }
 0x68d   :  { %1709 = vmatprep.subr.bf16.mxu0 %v3526_v35 }
 0x68f   :  { %3148 = vmatpush3.bf16.msra.mxu1 %v3515_v36  ;;  %v3524_v36 = vld [vmem:[#allocation10 + $0x230] ss:$20 sps:$4 sm:$0xff]  }
 0x690   :  { %3149 = vmatprep.subr.bf16.mxu1 %v3516_v38  ;;  %1710 = vmatpush1.bf16.msra.mxu0 %v3524_v36 }
 0x693   :  { %3150 = vmatpush3.bf16.msra.mxu1 %v3517_v39 }
 0x694   :  { %1750 = vmatprep.subr.bf16.mxu1 %v3523_v34 }
 0x736   :  { %v1168_v40 = vpop.f32.mrf.mxu1  ;;  %v1211_v56 = vpop.f32.mrf.mxu0 }
 0x737   :  { %v2913_v41 = vmul.f32 -1.442695, %v1168_v40 }
 0x738   :  { %v1170_v42 = vpop.f32.mrf.mxu1  ;;  %v1213_v57 = vpop.f32.mrf.mxu0 }
 0x739   :  { %3686 = vpow2.f32 %v2913_v41  ;;  %v2914_v43 = vmul.f32 -1.442695, %v1170_v42 }
 0x73a   :  { %v1172_v44 = vpop.f32.mrf.mxu1  ;;  %v1215_v4 = vpop.f32.mrf.mxu0 }
 0x73b   :  { %3688 = vpow2.f32 %v2914_v43  ;;  %v2915_v45 = vmul.f32 -1.442695, %v1172_v44 }
 0x73c   :  { %v1174_v46 = vpop.f32.mrf.mxu1  ;;  %v1217_v20 = vpop.f32.mrf.mxu0 }
 0x73d   :  { %3690 = vpow2.f32 %v2915_v45  ;;  %v2916_v47 = vmul.f32 -1.442695, %v1174_v46 }
 0x73f   :  { %3692 = vpow2.f32 %v2916_v47 }
 0x746   :  { %v3687_v48 = vpop.eup %3686 }
 0x747   :  { %v1232_v50 = vadd.f32 1.0, %v3687_v48  ;;  %v3529_v48 = vld [vmem:[#allocation10 + $0x23c] ss:$20 sps:$4 sm:$0xff]  }
 0x748   :  { %v3689_v49 = vpop.eup %3688 }
 0x749   :  { %v1233_v51 = vadd.f32 1.0, %v3689_v49  ;;  %v3527_v49 = vld [vmem:[#allocation10 + $0x238] ss:$20 sps:$4 sm:$0xff]  }
 0x74a   :  { %v3691_v52 = vpop.eup %3690 }
 0x74b   :  { %3694 = vrcp.f32 %v1233_v51  ;;  %v1234_v53 = vadd.f32 1.0, %v3691_v52  ;;  %v3535_v51 = vld [vmem:[#allocation10 + $0x214] ss:$20 sps:$4 sm:$0xff]   ;;  %v3533_v52 = vld [vmem:[#allocation10 + $0x210] ss:$20 sps:$4 sm:$0xff]  }
 0x74c   :  { %v3693_v54 = vpop.eup %3692  ;;  %3696 = vrcp.f32 %v1232_v50  ;;  %v3532_v50 = vld [vmem:[#allocation10 + $0x20c] ss:$20 sps:$4 sm:$0xff]  }
 0x74d   :  { %3698 = vrcp.f32 %v1234_v53  ;;  %v1235_v55 = vadd.f32 1.0, %v3693_v54  ;;  %1711 = vmatprep.subr.bf16.mxu0 %v3532_v50  ;;  %v3538_v53 = vld [vmem:[#allocation10 + $0x1e4] ss:$20 sps:$4 sm:$0xff]   ;;  %v3541_v54 = vld [vmem:[#allocation10 + $0x1ec] ss:$20 sps:$4 sm:$0xff]  }
 0x74e   :  { %v3570_v50 = vld [vmem:[#allocation10 + $0x1c8] ss:$20 sps:$4 sm:$0xff]  }
 0x74f   :  { %3700 = vrcp.f32 %v1235_v55  ;;  %v3539_v55 = vld [vmem:[#allocation10 + $0x1e8] ss:$20 sps:$4 sm:$0xff]  }
 0x758   :  { %v3695_v58 = vpop.eup %3694 }
 0x759   :  { %v3697_v60 = vpop.eup %3696  ;;  %v1245_v5 = vmul.f32 %v3695_v58, %v1170_v42  ;;  %v3547_v58 = vld [vmem:[#allocation10 + $0x1c4] ss:$20 sps:$4 sm:$0xff]  }
 0x75a   :  { %v3699_v0 = vpop.eup %3698  ;;  %v1244_v17 = vmul.f32 %v3697_v60, %v1168_v40  ;;  %v3545_v60 = vld [vmem:[#allocation10 + $0x1c0] ss:$20 sps:$4 sm:$0xff]  }
 0x75b   :  { %v1246_v6 = vmul.f32 %v3699_v0, %v1172_v44  ;;  %v1249_v21 = vmul.f32 %v1245_v5, %v1213_v57  ;;  %v3542_v57 = vld [vmem:[#allocation10 + $0x1b8] ss:$20 sps:$4 sm:$0xff]   ;;  %v3550_v0 = vld [vmem:[#allocation10 + $0x194] ss:$20 sps:$4 sm:$0xff]   ;;  %v3548_v5 = vld [vmem:[#allocation10 + $0x190] ss:$20 sps:$4 sm:$0xff]  }
 0x75c   :  { %v3701_v8 = vpop.eup %3700  ;;  %v1248_v25 = vmul.f32 %v1244_v17, %v1211_v56  ;;  %v3544_v56 = vld [vmem:[#allocation10 + $0x1bc] ss:$20 sps:$4 sm:$0xff]   ;;  %v3559_v17 = vld [vmem:[#allocation10 + $0x174] ss:$20 sps:$4 sm:$0xff]  }
 0x75d   :  { %v1247_v18 = vmul.f32 %v3701_v8, %v1174_v46  ;;  %v1250_v19 = vmul.f32 %v1246_v6, %v1215_v4  ;;  %v3553_v4 = vld [vmem:[#allocation10 + $0x19c] ss:$20 sps:$4 sm:$0xff]   ;;  %v3551_v6 = vld [vmem:[#allocation10 + $0x198] ss:$20 sps:$4 sm:$0xff]  }
 0x75e   :  { %v3556_v8 = vld [vmem:[#allocation10 + $0x16c] ss:$20 sps:$4 sm:$0xff]  }
 0x75f   :  { %v1251_v24 = vmul.f32 %v1247_v18, %v1217_v20  ;;  %v1284_v28 = vpack.c.bf16 %v1250_v19, %v1248_v25  ;;  %v3554_v18 = vld [vmem:[#allocation10 + $0x168] ss:$20 sps:$4 sm:$0xff]   ;;  %v3557_v19 = vld [vmem:[#allocation10 + $0x170] ss:$20 sps:$4 sm:$0xff]  }
 0x760   :  { %v3562_v20 = vld [vmem:[#allocation10 + $0x144] ss:$20 sps:$4 sm:$0xff]   ;;  %v3563_v25 = vld [vmem:[#allocation10 + $0x148] ss:$20 sps:$4 sm:$0xff]  }
 0x761   :  { %v1285_v26 = vpack.c.bf16 %v1251_v24, %v1249_v21  ;;  %v3565_v21 = vld [vmem:[#allocation10 + $0x14c] ss:$20 sps:$4 sm:$0xff]  }
 0x762   :  { %v3560_v24 = vld [vmem:[#allocation10 + $0x140] ss:$20 sps:$4 sm:$0xff]  }
 0x763   :  { %1414 = vmatprep.mubr.bf16.mxu1 %v1285_v26 }
 0x764   :  { %1415 = vmatmul.mubr.bf16.vlgmr.msra.gmra.mxu1 %v1284_v28 }
 0x765   :  { %1782 = vmatprep.mubr.bf16.mxu1 %v3970_v31  ;;  %1751 = vmatpush1.bf16.msra.mxu1 %v3521_v33 }
 0x766   :  { %1752 = vmatprep.subr.bf16.mxu1 %v3529_v48  ;;  %v3568_v48 = vld [vmem:[#allocation10 + $0x218] ss:$20 sps:$4 sm:$0xff]  }
 0x769   :  { %1753 = vmatpush1.bf16.msra.mxu1 %v3527_v49  ;;  %v3569_v49 = vld [vmem:[#allocation10 + $0x1f0] ss:$20 sps:$4 sm:$0xff]  }
 0x76a   :  { %1754 = vmatprep.subr.bf16.mxu1 %v3535_v51  ;;  %v3572_v51 = vld [vmem:[#allocation10 + $0x178] ss:$20 sps:$4 sm:$0xff]  }
 0x76d   :  { %1755 = vmatpush1.bf16.msra.mxu1 %v3533_v52  ;;  %v3573_v52 = vld [vmem:[#allocation10 + $0x150] ss:$20 sps:$4 sm:$0xff]  }
 0x76e   :  { %1756 = vmatprep.subr.bf16.mxu1 %v3541_v54 }
 0x771   :  { %1757 = vmatpush1.bf16.msra.mxu1 %v3539_v55 }
 0x772   :  { %1758 = vmatprep.subr.bf16.mxu1 %v3547_v58 }
 0x775   :  { %1759 = vmatpush1.bf16.msra.mxu1 %v3545_v60 }
 0x776   :  { %1760 = vmatprep.subr.bf16.mxu1 %v3553_v4 }
 0x779   :  { %1761 = vmatpush1.bf16.msra.mxu1 %v3551_v6 }
 0x77a   :  { %1762 = vmatprep.subr.bf16.mxu1 %v3559_v17 }
 0x77d   :  { %1763 = vmatpush1.bf16.msra.mxu1 %v3557_v19 }
 0x77e   :  { %1764 = vmatprep.subr.bf16.mxu1 %v3565_v21 }
 0x781   :  { %1765 = vmatpush1.bf16.msra.mxu1 %v3563_v25 }
 0x782   :  { %3308 = vmatprep.subr.bf16.mxu1 %v3971_v37 }
 0x824   :  { %v3151_v38 = vpop.f32.mrf.mxu1 }
 0x826   :  { %v3152_v39 = vpop.f32.mrf.mxu1 }
 0x827   :  { %v3153_v40 = vadd.f32 %v3152_v39, %v3151_v38  ;;  %v2933_v39 = vld [vmem:[#allocation8 + $0x1] ss:$0 sm:$0xff] }
 0x828   :  { %v3154_v41 = vpop.f32.mrf.mxu1 }
 0x829   :  { %v4332_v42 = vadd.f32 %v3153_v40, %v4268_v63  ;;  %v3530_v63 = vld [vmem:[#allocation10 + $0x208] ss:$20 sps:$4 sm:$0xff]  }
 0x82a   :  { %v3155_v43 = vpop.f32.mrf.mxu1  ;;  %1712 = vmatpush1.bf16.msra.mxu0 %v3530_v63  ;;  %v3571_v63 = vld [vmem:[#allocation10 + $0x1a0] ss:$20 sps:$4 sm:$0xff]  }
 0x82b   :  { %v3156_v44 = vadd.f32 %v3155_v43, %v3154_v41  ;;  %v1427_v45 = vmul.f32 %v4332_v42, %v4332_v42  ;;  %1713 = vmatprep.subr.bf16.mxu0 %v3538_v53 }
 0x82d   :  { %v4337_v46 = vadd.f32 %v3156_v44, %v4275_v7  ;;  %1429 = vadd.xlane.f32.xlu0 %v1427_v45  ;;  %v3536_v7 = vld [vmem:[#allocation10 + $0x1e0] ss:$20 sps:$4 sm:$0xff]   ;;  %v3566_v44 = vld [vmem:[#allocation10 + $0x268] ss:$20 sps:$4 sm:$0xff]  }
 0x82e   :  { %1714 = vmatpush1.bf16.msra.mxu0 %v3536_v7 }
 0x82f   :  { %v1428_v47 = vmul.f32 %v4337_v46, %v4337_v46  ;;  %1715 = vmatprep.subr.bf16.mxu0 %v3544_v56 }
 0x831   :  { %1431 = vadd.xlane.f32.xlu1 %v1428_v47  ;;  %v3567_v47 = vld [vmem:[#allocation10 + $0x240] ss:$20 sps:$4 sm:$0xff]  }
 0x832   :  { %1716 = vmatpush1.bf16.msra.mxu0 %v3542_v57 }
 0x833   :  { %1717 = vmatprep.subr.bf16.mxu0 %v3550_v0 }
 0x836   :  { %1718 = vmatpush1.bf16.msra.mxu0 %v3548_v5 }
 0x837   :  { %1719 = vmatprep.subr.bf16.mxu0 %v3556_v8 }
 0x83a   :  { %1720 = vmatpush1.bf16.msra.mxu0 %v3554_v18 }
 0x83b   :  { %1721 = vmatprep.subr.bf16.mxu0 %v3562_v20 }
 0x83e   :  { %1722 = vmatpush1.bf16.msra.mxu0 %v3560_v24 }
 0x83f   :  { %3288 = vmatprep.subr.bf16.mxu0 %v3971_v37 }
 0x8b6   :  { %v1430_v26 = vpop.xlane.xlu0 %1429 }
 0x8b7   :  { %v1433_v28 = vmul.f32 0.0078125, %v1430_v26 }
 0x8b9   :  { %v1435_v29 = vadd.f32 1e-05, %v1433_v28 }
 0x8ba   :  { %v1432_v32 = vpop.xlane.xlu1 %1431 }
 0x8bb   :  { %3702 = vrsqrt.f32 %v1435_v29  ;;  %v1434_v33 = vmul.f32 0.0078125, %v1432_v32 }
 0x8bd   :  { %v1436_v34 = vadd.f32 1e-05, %v1434_v33 }
 0x8bf   :  { %3704 = vrsqrt.f32 %v1436_v34 }
 0x8c8   :  { %v3703_v35 = vpop.eup %3702 }
 0x8c9   :  { %v1439_v36 = vmul.f32 %v3703_v35, %v4332_v42 }
 0x8cb   :  { %v1447_v41 = vmul.f32 %v2933_v39, %v1439_v36 }
 0x8cc   :  { %v3705_v38 = vpop.eup %3704 }
 0x8cd   :  { %v1440_v40 = vmul.f32 %v3705_v38, %v4337_v46 }
 0x8cf   :  { %v1448_v43 = vmul.f32 %v2933_v39, %v1440_v40 }
 0x8d1   :  { %v1498_v45 = vpack.c.bf16 %v1448_v43, %v1447_v41 }
 0x8d3   :  { %1740 = vmatmul.mubr.bf16.vlgmr.msra.gmra.mxu0 %v1498_v45  ;;  %1783 = vmatmul.mubr.bf16.vlgmr.msra.gmra.mxu1 %v1498_v45 }
 0x8d4   :  { %3289 = vmatpush3.bf16.msra.mxu0 %v3566_v44  ;;  %3304 = vmatprep.mubr.msk.bf16.mxu0 %vm3972_vm0, %v3971_v37 }
 0x8d5   :  { %3290 = vmatprep.subr.bf16.mxu0 %v3971_v37  ;;  %3316 = vmatprep.mubr.msk.bf16.mxu1 %vm3972_vm0, %v3971_v37 }
 0x8d8   :  { %3291 = vmatpush3.bf16.msra.mxu0 %v3567_v47 }
 0x8d9   :  { %3292 = vmatprep.subr.bf16.mxu0 %v3971_v37 }
 0x8dc   :  { %3293 = vmatpush3.bf16.msra.mxu0 %v3568_v48 }
 0x8dd   :  { %3294 = vmatprep.subr.bf16.mxu0 %v3971_v37 }
 0x8e0   :  { %3295 = vmatpush3.bf16.msra.mxu0 %v3569_v49 }
 0x8e1   :  { %3296 = vmatprep.subr.bf16.mxu0 %v3971_v37 }
 0x8e4   :  { %3297 = vmatpush3.bf16.msra.mxu0 %v3570_v50 }
 0x8e5   :  { %3298 = vmatprep.subr.bf16.mxu0 %v3971_v37 }
 0x8e8   :  { %3299 = vmatpush3.bf16.msra.mxu0 %v3571_v63 }
 0x8e9   :  { %3300 = vmatprep.subr.bf16.mxu0 %v3971_v37 }
 0x8ec   :  { %3301 = vmatpush3.bf16.msra.mxu0 %v3572_v51 }
 0x8ed   :  { %3302 = vmatprep.subr.bf16.mxu0 %v3971_v37 }
 0x8f0   :  { %3303 = vmatpush3.bf16.msra.mxu0 %v3573_v52 }
 0x8f1   :  { %3320 = vmatprep.subr.bf16.mxu0 %v3971_v37 }
 0x8f3   :  { %3305 = vmatmul.mubr.bf16.vlgmr.msra.gmra.mxu0 %v1498_v45 }
 0x8f4   :  { %3321 = vmatpush3.bf16.msra.mxu0 %v4209_v11  ;;  %3328 = vmatprep.mubr.msk.bf16.mxu0 %vm3972_vm0, %v3971_v37 }
 0x8f5   :  { %3322 = vmatprep.subr.bf16.mxu0 %v3971_v37 }
 0x8f8   :  { %3323 = vmatpush3.bf16.msra.mxu0 %v4212_v12 }
 0x8f9   :  { %3324 = vmatprep.subr.bf16.mxu0 %v3971_v37 }
 0x8fc   :  { %3325 = vmatpush3.bf16.msra.mxu0 %v4216_v13 }
 0x8fd   :  { %3326 = vmatprep.subr.bf16.mxu0 %v3971_v37 }
 0x900   :  { %3327 = vmatpush3.bf16.msra.mxu0 %v4220_v14 }
 0x901   :  { %3344 = vmatprep.subr.bf16.mxu0 %v3971_v37 }
 0x993   :  { %v1784_v53 = vpop.f32.mrf.mxu1  ;;  %v1741_v5 = vpop.f32.mrf.mxu0 }
 0x994   :  { %v1840_v55 = vmul.f32 %v1784_v53, %v4131_v62  ;;  %v1834_v39 = vmul.f32 %v1741_v5, %v4131_v62 }
 0x995   :  { %v1786_v7 = vpop.f32.mrf.mxu1  ;;  %v1743_v17 = vpop.f32.mrf.mxu0 }
 0x996   :  { %v1842_v11 = vmul.f32 %v1786_v7, %v4126_v61  ;;  %v1836_v35 = vmul.f32 %v1743_v17, %v4126_v61 }
 0x997   :  { %v1788_v54 = vpop.f32.mrf.mxu1  ;;  %v1745_v19 = vpop.f32.mrf.mxu0 }
 0x998   :  { %v1844_v57 = vadd.f32 %v1842_v11, %v1840_v55  ;;  %v1841_v12 = vmul.f32 %v1788_v54, %v4137_v1  ;;  %v1835_v36 = vmul.f32 %v1745_v19, %v4137_v1  ;;  %v1838_v43 = vadd.f32 %v1836_v35, %v1834_v39  ;;  %v3585_v35 = vld [vmem:[#allocation13 + $0x1e8] ss:$16 sps:$4 sm:$0xff]  }
 0x999   :  { %v1790_v56 = vpop.f32.mrf.mxu1  ;;  %v1747_v24 = vpop.f32.mrf.mxu0 }
 0x99a   :  { %v1843_v58 = vmul.f32 %v1790_v56, %v4139_v3  ;;  %v1852_v60 = vmul.f32 %v1844_v57, %v4144_v9  ;;  %v1850_v6 = vmul.f32 %v1844_v57, %v4153_v16  ;;  %v1848_v20 = vmul.f32 %v1844_v57, %v4160_v23 }
 0x99b   :  { %v1846_v29 = vmul.f32 %v1844_v57, %v4166_v30  ;;  %v1837_v32 = vmul.f32 %v1747_v24, %v4139_v3  ;;  %v3581_v24 = vld [vmem:[%s4518_s8 + $0x40] sm:$0xff]  }
 0x99c   :  { %v1845_v13 = vadd.f32 %v1843_v58, %v1841_v12  ;;  %v3575_v12 = vld [vmem:[%s4518_s8 + $0x70] sm:$0xff]   ;;  %v3576_v58 = vld [vmem:[%s4518_s8 + $0x68] sm:$0xff]  }
 0x99d   :  { %v1839_v40 = vadd.f32 %v1837_v32, %v1835_v36  ;;  %v3587_v36 = vld [vmem:[#allocation13 + $0x1ec] ss:$16 sps:$4 sm:$0xff]  }
 0x99e   :  { %v1853_v14 = vmul.f32 %v1845_v13, %v4146_v10  ;;  %v1851_v4 = vmul.f32 %v1845_v13, %v4150_v15  ;;  %v1849_v18 = vmul.f32 %v1845_v13, %v4157_v22  ;;  %v1847_v26 = vmul.f32 %v1845_v13, %v4164_v27  ;;  %v3577_v13 = vld [vmem:[%s4518_s8 + $0x60] sm:$0xff]  }
 0x99f   :  { %v1862_v45 = vpack.c.bf16 %v1839_v40, %v1838_v43 }
 0x9a0   :  { %v1866_v0 = vpack.c.bf16 %v1853_v14, %v1852_v60  ;;  %v1865_v8 = vpack.c.bf16 %v1851_v4, %v1850_v6  ;;  %v1864_v21 = vpack.c.bf16 %v1849_v18, %v1848_v20  ;;  %v1863_v34 = vpack.c.bf16 %v1847_v26, %v1846_v29  ;;  %v3578_v60 = vld [vmem:[%s4518_s8 + $0x58] sm:$0xff]   ;;  %v3579_v14 = vld [vmem:[%s4518_s8 + $0x50] sm:$0xff]  }
 0x9a2   :  { %3309 = vmatpush3.bf16.xpose.msra.mxu1 %v1866_v0 }
 0x9a3   :  { %3310 = vmatprep.subr.bf16.mxu1 %v3971_v37 }
 0x9aa   :  { %3311 = vmatpush3.bf16.xpose.msra.mxu1 %v1865_v8 }
 0x9ab   :  { %3312 = vmatprep.subr.bf16.mxu1 %v3971_v37 }
 0x9b2   :  { %3313 = vmatpush3.bf16.xpose.msra.mxu1 %v1864_v21  ;;  %v3580_v21 = vld [vmem:[%s4518_s8 + $0x48] sm:$0xff]  }
 0x9b3   :  { %v1827_v25 = vpop.f32.mrf.mxu0  ;;  %3314 = vmatprep.subr.bf16.mxu1 %v3971_v37 }
 0x9b4   :  { %v1860_v44 = vmul.f32 %v1827_v25, %v4144_v9  ;;  %v1858_v61 = vmul.f32 %v1827_v25, %v4153_v16  ;;  %v1854_v48 = vmul.f32 %v1827_v25, %v4166_v30 }
 0x9b5   :  { %v3306_v28 = vpop.f32.mrf.mxu0 }
 0x9b7   :  { %v1830_v33 = vpop.f32.mrf.mxu0 }
 0x9b8   :  { %v1861_v41 = vmul.f32 %v1830_v33, %v4146_v10  ;;  %v1859_v3 = vmul.f32 %v1830_v33, %v4150_v15  ;;  %v1857_v62 = vmul.f32 %v1830_v33, %v4157_v22  ;;  %v1856_v10 = vmul.f32 %v1827_v25, %v4160_v23 }
 0x9b9   :  { %v3307_v38 = vpop.f32.mrf.mxu0  ;;  %v1855_v9 = vmul.f32 %v1830_v33, %v4164_v27  ;;  %v3582_v33 = vld [vmem:[#allocation13 + $0x1e0] ss:$16 sps:$4 sm:$0xff]  }
 0x9ba   :  { %3315 = vmatpush3.bf16.xpose.msra.mxu1 %v1863_v34  ;;  %v1973_v47 = vpack.c.bf16 %v1861_v41, %v1860_v44  ;;  %v1972_v1 = vpack.c.bf16 %v1859_v3, %v1858_v61  ;;  %v1971_v15 = vpack.c.bf16 %v1857_v62, %v1856_v10  ;;  %v3584_v34 = vld [vmem:[#allocation13 + $0x1e4] ss:$16 sps:$4 sm:$0xff]   ;;  %v3588_v61 = vld [vmem:[#allocation13 + $0x1c0] ss:$16 sps:$4 sm:$0xff]   ;;  %v3591_v62 = vld [vmem:[#allocation13 + $0x1c8] ss:$16 sps:$4 sm:$0xff]  }
 0x9bb   :  { %3332 = vmatprep.subr.bf16.mxu1 %v3971_v37  ;;  %v1970_v16 = vpack.c.bf16 %v1855_v9, %v1854_v48  ;;  %v3590_v3 = vld [vmem:[#allocation13 + $0x1c4] ss:$16 sps:$4 sm:$0xff]   ;;  %v3594_v10 = vld [vmem:[#allocation13 + $0x1a0] ss:$16 sps:$4 sm:$0xff]   ;;  %v3597_v9 = vld [vmem:[#allocation13 + $0x1a8] ss:$16 sps:$4 sm:$0xff]  }
 0x9bc   :  { %v3600_v48 = vld [vmem:[#allocation13 + $0x180] ss:$16 sps:$4 sm:$0xff]  }
 0x9c1   :  { %3317 = vmatmul.mubr.bf16.vlgmr.msra.gmra.mxu1 %v1862_v45 }
 0x9c2   :  { %3333 = vmatpush3.bf16.msra.mxu1 %v1973_v47  ;;  %3340 = vmatprep.mubr.msk.bf16.mxu1 %vm3972_vm0, %v3971_v37  ;;  %v3593_v47 = vld [vmem:[#allocation13 + $0x1cc] ss:$16 sps:$4 sm:$0xff]  }
 0x9c3   :  { %3334 = vmatprep.subr.bf16.mxu1 %v3971_v37 }
 0x9c6   :  { %3335 = vmatpush3.bf16.msra.mxu1 %v1972_v1  ;;  %v3599_v1 = vld [vmem:[#allocation13 + $0x1ac] ss:$16 sps:$4 sm:$0xff]  }
 0x9c7   :  { %3336 = vmatprep.subr.bf16.mxu1 %v3971_v37 }
 0x9ca   :  { %3337 = vmatpush3.bf16.msra.mxu1 %v1971_v15  ;;  %v3605_v15 = vld [vmem:[#allocation13 + $0x18c] ss:$16 sps:$4 sm:$0xff]  }
 0x9cb   :  { %3338 = vmatprep.subr.bf16.mxu1 %v3971_v37 }
 0x9ce   :  { %3339 = vmatpush3.bf16.msra.mxu1 %v1970_v16  ;;  %v3603_v16 = vld [vmem:[#allocation13 + $0x188] ss:$16 sps:$4 sm:$0xff]  }
 0x9cf   :  { %2345 = vmatprep.subr.bf16.mxu1 %v3584_v34  ;;  %v3641_v34 = vld [vmem:[%s4521_s11 + $0x90] sm:$0xff]  }
 0xa81   :  { %v1901_v49 = vpop.f32.mrf.mxu1 }
 0xa82   :  { %v1902_v50 = vadd.f32 %v1901_v49, %v4198_v59  ;;  %v3608_v49 = vld [vmem:[#allocation13 + $0x164] ss:$16 sps:$4 sm:$0xff]  }
 0xa83   :  { %v3318_v22 = vpop.f32.mrf.mxu1 }
 0xa84   :  { %v1908_v63 = vsel %vm675_vm1, %v1902_v50, -inf  ;;  %v3606_v22 = vld [vmem:[#allocation13 + $0x160] ss:$16 sps:$4 sm:$0xff]  }
 0xa85   :  { %1909 = vmax.xlane.f32.xlu0 %v1908_v63  ;;  %v1904_v23 = vpop.f32.mrf.mxu1  ;;  %v3609_v63 = vld [vmem:[#allocation13 + $0x168] ss:$16 sps:$4 sm:$0xff]  }
 0xa86   :  { %v1905_v51 = vadd.f32 %v1904_v23, %v4204_v2  ;;  %v3574_v2 = vld [vmem:[%s4518_s8 + $0x78] sm:$0xff]  }
 0xa87   :  { %v3319_v52 = vpop.f32.mrf.mxu1  ;;  %v3614_v23 = vld [vmem:[#allocation13 + $0x144] ss:$16 sps:$4 sm:$0xff]  }
 0xa88   :  { %v1911_v27 = vsel %vm675_vm1, %v1905_v51, -inf  ;;  %v3612_v52 = vld [vmem:[#allocation13 + $0x140] ss:$16 sps:$4 sm:$0xff]  }
 0xa89   :  { %1912 = vmax.xlane.f32.xlu1 %v1911_v27  ;;  %v3615_v27 = vld [vmem:[#allocation13 + $0x148] ss:$16 sps:$4 sm:$0xff]  }
 0xb0e   :  { %v1910_v30 = vpop.xlane.xlu0 %1909 }
 0xb0f   :  { %v1914_v53 = vsub.f32 %v1902_v50, %v1910_v30  ;;  %v3611_v50 = vld [vmem:[#allocation13 + $0x16c] ss:$16 sps:$4 sm:$0xff]   ;;  %v3620_v30 = vld [vmem:[#allocation13 + $0x124] ss:$16 sps:$4 sm:$0xff]  }
 0xb11   :  { %v1916_v7 = vmul.f32 1.442695, %v1914_v53  ;;  %v3623_v53 = vld [vmem:[#allocation13 + $0x12c] ss:$16 sps:$4 sm:$0xff]  }
 0xb12   :  { %v1913_v11 = vpop.xlane.xlu1 %1912 }
 0xb13   :  { %v1915_v54 = vsub.f32 %v1905_v51, %v1913_v11  ;;  %3706 = vpow2.f32 %v1916_v7  ;;  %v3617_v51 = vld [vmem:[#allocation13 + $0x14c] ss:$16 sps:$4 sm:$0xff]   ;;  %v3618_v7 = vld [vmem:[#allocation13 + $0x120] ss:$16 sps:$4 sm:$0xff]   ;;  %v3621_v11 = vld [vmem:[#allocation13 + $0x128] ss:$16 sps:$4 sm:$0xff]  }
 0xb15   :  { %v1918_v55 = vmul.f32 1.442695, %v1915_v54  ;;  %v3626_v54 = vld [vmem:[#allocation13 + $0x104] ss:$16 sps:$4 sm:$0xff]  }
 0xb17   :  { %3708 = vpow2.f32 %v1918_v55  ;;  %v3629_v55 = vld [vmem:[#allocation13 + $0x10c] ss:$16 sps:$4 sm:$0xff]  }
 0xb20   :  { %v3707_v59 = vpop.eup %3706 }
 0xb24   :  { %v3709_v56 = vpop.eup %3708 }
 0xb25   :  { %v1920_v57 = vpack.c.bf16 %v3709_v56, %v3707_v59 }
 0xb27   :  { %3329 = vmatmul.mubr.msk.bf16.vlgmr.msra.gmra.mxu0 %vm675_vm1, %v1920_v57 }
 0xb28   :  { %3360 = vmatprep.mubr.msk.bf16.mxu0 %vm3972_vm0, %v3971_v37  ;;  %3345 = vmatpush3.bf16.msra.mxu0 %v3574_v2 }
 0xb29   :  { %3346 = vmatprep.subr.bf16.mxu0 %v3971_v37 }
 0xb2c   :  { %3347 = vmatpush3.bf16.msra.mxu0 %v3575_v12 }
 0xb2d   :  { %3348 = vmatprep.subr.bf16.mxu0 %v3971_v37 }
 0xb30   :  { %3349 = vmatpush3.bf16.msra.mxu0 %v3576_v58 }
 0xb31   :  { %3350 = vmatprep.subr.bf16.mxu0 %v3971_v37 }
 0xb34   :  { %3351 = vmatpush3.bf16.msra.mxu0 %v3577_v13 }
 0xb35   :  { %3352 = vmatprep.subr.bf16.mxu0 %v3971_v37 }
 0xb38   :  { %3353 = vmatpush3.bf16.msra.mxu0 %v3578_v60 }
 0xb39   :  { %3354 = vmatprep.subr.bf16.mxu0 %v3971_v37 }
 0xb3c   :  { %3355 = vmatpush3.bf16.msra.mxu0 %v3579_v14 }
 0xb3d   :  { %3356 = vmatprep.subr.bf16.mxu0 %v3971_v37 }
 0xb40   :  { %3357 = vmatpush3.bf16.msra.mxu0 %v3580_v21  ;;  %v3632_v21 = vld [vmem:[%s4521_s11 + $0xf0] sm:$0xff]  }
 0xb41   :  { %3358 = vmatprep.subr.bf16.mxu0 %v3971_v37 }
 0xb44   :  { %3359 = vmatpush3.bf16.msra.mxu0 %v3581_v24  ;;  %v3633_v24 = vld [vmem:[%s4521_s11 + $0xb0] sm:$0xff]  }
 0xb45   :  { %2388 = vmatprep.subr.bf16.mxu0 %v3587_v36  ;;  %v3643_v36 = vld [vmem:[%s4521_s11 + $0x88] sm:$0xff]  }
 0xbe7   :  { %v1958_v0 = vpop.f32.mrf.mxu0 }
 0xbe8   :  { %3710 = vrcp.f32 %v1958_v0 }
 0xbe9   :  { %v3330_v4 = vpop.f32.mrf.mxu0 }
 0xbeb   :  { %v1961_v5 = vpop.f32.mrf.mxu0 }
 0xbec   :  { %3712 = vrcp.f32 %v1961_v5  ;;  %v3000_v5 = vld [vmem:[#allocation11 + $0x1] ss:$0 sm:$0xff] }
 0xbed   :  { %v3331_v6 = vpop.f32.mrf.mxu0 }
 0xbf5   :  { %v3711_v8 = vpop.eup %3710 }
 0xbf6   :  { %v1967_v18 = vmul.f32 %v3711_v8, %v3707_v59  ;;  %v3624_v59 = vld [vmem:[#allocation13 + $0x100] ss:$16 sps:$4 sm:$0xff]  }
 0xbf9   :  { %v3713_v17 = vpop.eup %3712 }
 0xbfa   :  { %v1968_v19 = vmul.f32 %v3713_v17, %v3709_v56  ;;  %v3627_v56 = vld [vmem:[#allocation13 + $0x108] ss:$16 sps:$4 sm:$0xff]  }
 0xbfc   :  { %v1969_v20 = vpack.c.bf16 %v1968_v19, %v1967_v18  ;;  %v3630_v19 = vld [vmem:[%s4521_s11 + $0xf8] sm:$0xff]  }
 0xbfe   :  { %3341 = vmatmul.mubr.msk.bf16.vlgmr.msra.gmra.mxu1 %vm675_vm1, %v1969_v20  ;;  %v3631_v20 = vld [vmem:[%s4521_s11 + $0xb8] sm:$0xff]  }
 0xbff   :  { %2377 = vmatprep.mubr.bf16.mxu1 %v3970_v31  ;;  %2346 = vmatpush1.bf16.msra.mxu1 %v3582_v33  ;;  %v3640_v33 = vld [vmem:[%s4521_s11 + $0xd0] sm:$0xff]  }
 0xc00   :  { %2347 = vmatprep.subr.bf16.mxu1 %v3590_v3 }
 0xc03   :  { %2348 = vmatpush1.bf16.msra.mxu1 %v3588_v61 }
 0xcbe   :  { %v2011_v25 = vpop.f32.mrf.mxu1 }
 0xcc0   :  { %v3342_v26 = vpop.f32.mrf.mxu1 }
 0xcc1   :  { %v3636_v26 = vld [vmem:[%s4521_s11 + $0xe0] sm:$0xff]  }
 0xcc2   :  { %v2014_v28 = vpop.f32.mrf.mxu1 }
 0xcc3   :  { %v2035_v29 = vpack.c.bf16 %v2014_v28, %v2011_v25  ;;  %v3635_v25 = vld [vmem:[%s4521_s11 + $0xa8] sm:$0xff]   ;;  %v3637_v28 = vld [vmem:[%s4521_s11 + $0xa0] sm:$0xff]  }
 0xcc4   :  { %v3343_v32 = vpop.f32.mrf.mxu1 }
 0xcc5   :  { %3361 = vmatmul.mubr.bf16.vlgmr.msra.gmra.mxu0 %v2035_v29  ;;  %v3638_v29 = vld [vmem:[%s4521_s11 + $0xd8] sm:$0xff]  }
 0xcc6   :  { %2420 = vmatprep.mubr.bf16.mxu0 %v3970_v31  ;;  %2389 = vmatpush1.bf16.msra.mxu0 %v3585_v35  ;;  %v3639_v32 = vld [vmem:[%s4521_s11 + $0x98] sm:$0xff]   ;;  %v3642_v35 = vld [vmem:[%s4521_s11 + $0xc8] sm:$0xff]  }
 0xcc7   :  { %2390 = vmatprep.subr.bf16.mxu0 %v3593_v47 }
 0xcca   :  { %2391 = vmatpush1.bf16.msra.mxu0 %v3591_v62 }
 0xccb   :  { %2392 = vmatprep.subr.bf16.mxu0 %v3599_v1 }
 0xcce   :  { %2393 = vmatpush1.bf16.msra.mxu0 %v3597_v9 }
 0xccf   :  { %2394 = vmatprep.subr.bf16.mxu0 %v3605_v15 }
 0xcd2   :  { %2395 = vmatpush1.bf16.msra.mxu0 %v3603_v16 }
 0xcd3   :  { %2396 = vmatprep.subr.bf16.mxu0 %v3611_v50 }
 0xcd6   :  { %2397 = vmatpush1.bf16.msra.mxu0 %v3609_v63 }
 0xcd7   :  { %2398 = vmatprep.subr.bf16.mxu0 %v3617_v51 }
 0xcda   :  { %2399 = vmatpush1.bf16.msra.mxu0 %v3615_v27 }
 0xcdb   :  { %2400 = vmatprep.subr.bf16.mxu0 %v3623_v53 }
 0xcde   :  { %2401 = vmatpush1.bf16.msra.mxu0 %v3621_v11 }
 0xcdf   :  { %2402 = vmatprep.subr.bf16.mxu0 %v3629_v55 }
 0xce2   :  { %2403 = vmatpush1.bf16.msra.mxu0 %v3627_v56 }
 0xd85   :  { %v2118_v37 = vpop.f32.mrf.mxu0 }
 0xd86   :  { %v4442_v38 = vadd.f32 %v2118_v37, %v4332_v42  ;;  %v3596_v42 = vld [vmem:[#allocation13 + $0x1a4] ss:$16 sps:$4 sm:$0xff]   ;;  %v3644_v37 = vld [vmem:[%s4521_s11 + $0xc0] sm:$0xff]  }
 0xd87   :  { %v3362_v39 = vpop.f32.mrf.mxu0  ;;  %2349 = vmatprep.subr.bf16.mxu1 %v3596_v42 }
 0xd88   :  { %v2129_v40 = vmul.f32 %v4442_v38, %v4442_v38  ;;  %2350 = vmatpush1.bf16.msra.mxu1 %v3594_v10  ;;  %v3645_v39 = vld [vmem:[%s4521_s11 + $0x80] sm:$0xff]  }
 0xd89   :  { %v2121_v41 = vpop.f32.mrf.mxu0 }
 0xd8a   :  { %v4447_v43 = vadd.f32 %v2121_v41, %v4337_v46  ;;  %2131 = vadd.xlane.f32.xlu0 %v2129_v40  ;;  %v3602_v46 = vld [vmem:[#allocation13 + $0x184] ss:$16 sps:$4 sm:$0xff]  }
 0xd8b   :  { %v3363_v44 = vpop.f32.mrf.mxu0  ;;  %2351 = vmatprep.subr.bf16.mxu1 %v3602_v46 }
 0xd8c   :  { %v2130_v45 = vmul.f32 %v4447_v43, %v4447_v43  ;;  %2352 = vmatpush1.bf16.msra.mxu1 %v3600_v48 }
 0xd8d   :  { %2353 = vmatprep.subr.bf16.mxu1 %v3608_v49 }
 0xd8e   :  { %2133 = vadd.xlane.f32.xlu1 %v2130_v45 }
 0xd90   :  { %2354 = vmatpush1.bf16.msra.mxu1 %v3606_v22 }
 0xd91   :  { %2355 = vmatprep.subr.bf16.mxu1 %v3614_v23 }
 0xd94   :  { %2356 = vmatpush1.bf16.msra.mxu1 %v3612_v52 }
 0xd95   :  { %2357 = vmatprep.subr.bf16.mxu1 %v3620_v30 }
 0xd98   :  { %2358 = vmatpush1.bf16.msra.mxu1 %v3618_v7 }
 0xd99   :  { %2359 = vmatprep.subr.bf16.mxu1 %v3626_v54 }
 0xd9c   :  { %2360 = vmatpush1.bf16.msra.mxu1 %v3624_v59 }
 0xd9d   :  { %3190 = vmatprep.subr.bf16.mxu1 %v3630_v19  ;;  %v3651_v19 = vld [vmem:[#allocation16 + $0x64] ss:$8 sps:$4 sm:$0xff]  }
 0xe13   :  { %v2132_v57 = vpop.xlane.xlu0 %2131 }
 0xe14   :  { %v2135_v2 = vmul.f32 0.0078125, %v2132_v57 }
 0xe16   :  { %v2137_v12 = vadd.f32 1e-05, %v2135_v2 }
 0xe17   :  { %v2134_v58 = vpop.xlane.xlu1 %2133 }
 0xe18   :  { %3714 = vrsqrt.f32 %v2137_v12  ;;  %v2136_v13 = vmul.f32 0.0078125, %v2134_v58  ;;  %v3646_v12 = vld [vmem:[#allocation16 + $0x70] ss:$8 sps:$4 sm:$0xff]   ;;  %v3648_v58 = vld [vmem:[#allocation16 + $0x74] ss:$8 sps:$4 sm:$0xff]  }
 0xe19   :  { %2757 = vmatprep.subr.bf16.mxu0 %v3648_v58 }
 0xe1a   :  { %v2138_v60 = vadd.f32 1e-05, %v2136_v13 }
 0xe1c   :  { %3716 = vrsqrt.f32 %v2138_v60 }
 0xe25   :  { %v3715_v14 = vpop.eup %3714 }
 0xe26   :  { %v2141_v0 = vmul.f32 %v3715_v14, %v4442_v38 }
 0xe28   :  { %v2149_v8 = vmul.f32 %v3000_v5, %v2141_v0 }
 0xe29   :  { %v3717_v4 = vpop.eup %3716 }
 0xe2a   :  { %v2142_v6 = vmul.f32 %v3717_v4, %v4447_v43 }
 0xe2c   :  { %v2150_v17 = vmul.f32 %v3000_v5, %v2142_v6 }
 0xe2e   :  { %v2184_v18 = vpack.c.bf16 %v2150_v17, %v2149_v8 }
 0xe30   :  { %2378 = vmatmul.mubr.bf16.vlgmr.msra.gmra.mxu1 %v2184_v18  ;;  %2421 = vmatmul.mubr.bf16.vlgmr.msra.gmra.mxu0 %v2184_v18 }
 0xe31   :  { %2789 = vmatprep.mubr.bf16.mxu0 %v3970_v31  ;;  %3191 = vmatpush3.bf16.msra.mxu1 %v3631_v20  ;;  %v3634_v31 = vld [vmem:[%s4521_s11 + $0xe8] sm:$0xff]   ;;  %v3649_v20 = vld [vmem:[#allocation16 + $0x60] ss:$8 sps:$4 sm:$0xff]   ;;  %s3973_s11 = smov [#allocation17]  }
 0xe32   :  { %3192 = vmatprep.subr.bf16.mxu1 %v3632_v21  ;;  %2758 = vmatpush1.bf16.msra.mxu0 %v3646_v12  ;;  %v3654_v21 = vld [vmem:[#allocation16 + $0x54] ss:$8 sps:$4 sm:$0xff]   ;;  %s2809_s0 = sshll.u32 %s3973_s11, 4  ;;  %s2810_s0 = int_to_ptr.vmem [resolvable:$true] %s2809_s0 }
 0xe33   :  { %2759 = vmatprep.subr.bf16.mxu0 %v3651_v19  ;;  %s3920_s6 = scalar_lea.vmem %s2810_s0, 512  ;;  %p3925_p4 = scmp.lt.s32.totalorder %s2810_s0, %s2810_s0 }
 0xe34   :  { %p3921_p3 = scmp.ne.s32.totalorder %s2810_s0, %s3920_s6  ;;  %p3926_p5 = scmp.lt.s32.totalorder %s3920_s6, %s3920_s6 }
 0xe35   :  { %3193 = vmatpush3.bf16.msra.mxu1 %v3633_v24  ;;  %v3652_v24 = vld [vmem:[#allocation16 + $0x50] ss:$8 sps:$4 sm:$0xff]  }
 0xe36   :  { %3194 = vmatprep.subr.bf16.mxu1 %v3634_v31  ;;  %2760 = vmatpush1.bf16.msra.mxu0 %v3649_v20  ;;  %v3657_v31 = vld [vmem:[#allocation16 + $0x44] ss:$8 sps:$4 sm:$0xff]   ;;  %p3927_p6 = por %p3926_p5, %p3925_p4 }
 0xe37   :  { %2761 = vmatprep.subr.bf16.mxu0 %v3654_v21 }
 0xe38   :  { %p3928_p7 = pnand %p3927_p6, %p3921_p3 }
 0xe39   :  { %3195 = vmatpush3.bf16.msra.mxu1 %v3635_v25  ;;  %v3655_v25 = vld [vmem:[#allocation16 + $0x40] ss:$8 sps:$4 sm:$0xff]  }
 0xe3a   :  { %3196 = vmatprep.subr.bf16.mxu1 %v3636_v26  ;;  %2762 = vmatpush1.bf16.msra.mxu0 %v3652_v24  ;;  %v3660_v26 = vld [vmem:[#allocation16 + $0x34] ss:$8 sps:$4 sm:$0xff]  }
 0xe3b   :  { %2763 = vmatprep.subr.bf16.mxu0 %v3657_v31 }
 0xe3d   :  { %3197 = vmatpush3.bf16.msra.mxu1 %v3637_v28  ;;  %v3663_v28 = vld [vmem:[#allocation16 + $0x24] ss:$8 sps:$4 sm:$0xff]  }
 0xe3e   :  { %3198 = vmatprep.subr.bf16.mxu1 %v3638_v29  ;;  %2764 = vmatpush1.bf16.msra.mxu0 %v3655_v25  ;;  %v3666_v29 = vld [vmem:[#allocation16 + $0x14] ss:$8 sps:$4 sm:$0xff]  }
 0xe3f   :  { %2765 = vmatprep.subr.bf16.mxu0 %v3660_v26 }
 0xe41   :  { %3199 = vmatpush3.bf16.msra.mxu1 %v3639_v32  ;;  %v3664_v32 = vld [vmem:[#allocation16 + $0x10] ss:$8 sps:$4 sm:$0xff]  }
 0xe42   :  { %3200 = vmatprep.subr.bf16.mxu1 %v3640_v33  ;;  %v3669_v33 = vld [vmem:[#allocation16 + $0x4] ss:$8 sps:$4 sm:$0xff]  }
 0xe45   :  { %3201 = vmatpush3.bf16.msra.mxu1 %v3641_v34  ;;  %v3667_v34 = vld [vmem:[#allocation16] ss:$8 sps:$4 sm:$0xff]  }
 0xe46   :  { %3202 = vmatprep.subr.bf16.mxu1 %v3642_v35 }
 0xe49   :  { %3203 = vmatpush3.bf16.msra.mxu1 %v3643_v36 }
 0xe4a   :  { %3204 = vmatprep.subr.bf16.mxu1 %v3644_v37 }
 0xe4d   :  { %3205 = vmatpush3.bf16.msra.mxu1 %v3645_v39 }
 0xef0   :  { %v2379_v40 = vpop.f32.mrf.mxu1  ;;  %v2422_v49 = vpop.f32.mrf.mxu0 }
 0xef1   :  { %v3033_v41 = vmul.f32 -1.442695, %v2379_v40 }
 0xef2   :  { %v2381_v44 = vpop.f32.mrf.mxu1  ;;  %v2424_v50 = vpop.f32.mrf.mxu0 }
 0xef3   :  { %3718 = vpow2.f32 %v3033_v41  ;;  %v3034_v45 = vmul.f32 -1.442695, %v2381_v44 }
 0xef4   :  { %v2383_v3 = vpop.f32.mrf.mxu1  ;;  %v2426_v51 = vpop.f32.mrf.mxu0 }
 0xef5   :  { %3720 = vpow2.f32 %v3034_v45  ;;  %v3035_v47 = vmul.f32 -1.442695, %v2383_v3 }
 0xef6   :  { %v2385_v61 = vpop.f32.mrf.mxu1  ;;  %v2428_v54 = vpop.f32.mrf.mxu0 }
 0xef7   :  { %3722 = vpow2.f32 %v3035_v47  ;;  %v3036_v62 = vmul.f32 -1.442695, %v2385_v61  ;;  %v3085_v47 = vld [vmem:[#allocation14] ss:$0 sm:$0xff] }
 0xef9   :  { %3724 = vpow2.f32 %v3036_v62 }
 0xf00   :  { %v3719_v42 = vpop.eup %3718 }
 0xf01   :  { %v2443_v10 = vadd.f32 1.0, %v3719_v42 }
 0xf02   :  { %v3721_v1 = vpop.eup %3720 }
 0xf03   :  { %v2444_v9 = vadd.f32 1.0, %v3721_v1 }
 0xf04   :  { %v3723_v46 = vpop.eup %3722 }
 0xf05   :  { %3726 = vrcp.f32 %v2444_v9  ;;  %v2445_v15 = vadd.f32 1.0, %v3723_v46 }
 0xf06   :  { %v3725_v48 = vpop.eup %3724  ;;  %3728 = vrcp.f32 %v2443_v10 }
 0xf07   :  { %3730 = vrcp.f32 %v2445_v15  ;;  %v2446_v16 = vadd.f32 1.0, %v3725_v48 }
 0xf09   :  { %3732 = vrcp.f32 %v2446_v16 }
 0xf12   :  { %v3727_v22 = vpop.eup %3726 }
 0xf13   :  { %v3729_v63 = vpop.eup %3728  ;;  %v2456_v52 = vmul.f32 %v3727_v22, %v2381_v44 }
 0xf14   :  { %v3731_v23 = vpop.eup %3730  ;;  %v2455_v53 = vmul.f32 %v3729_v63, %v2379_v40 }
 0xf15   :  { %v2457_v27 = vmul.f32 %v3731_v23, %v2383_v3  ;;  %v2460_v55 = vmul.f32 %v2456_v52, %v2424_v50 }
 0xf16   :  { %v3733_v30 = vpop.eup %3732  ;;  %v2459_v56 = vmul.f32 %v2455_v53, %v2422_v49 }
 0xf17   :  { %v2458_v7 = vmul.f32 %v3733_v30, %v2385_v61  ;;  %v2461_v11 = vmul.f32 %v2457_v27, %v2426_v51 }
 0xf19   :  { %v2462_v59 = vmul.f32 %v2458_v7, %v2428_v54  ;;  %v2496_v2 = vpack.c.bf16 %v2461_v11, %v2459_v56 }
 0xf1b   :  { %v2497_v57 = vpack.c.bf16 %v2462_v59, %v2460_v55 }
 0xf1d   :  { %2626 = vmatprep.mubr.bf16.mxu1 %v2497_v57 }
 0xf1e   :  { %2627 = vmatmul.mubr.bf16.vlgmr.msra.gmra.mxu1 %v2496_v2 }
 0xfde   :  { %v3206_v13 = vpop.f32.mrf.mxu1 }
 0xfe0   :  { %v3207_v60 = vpop.f32.mrf.mxu1 }
 0xfe1   :  { %v3208_v14 = vadd.f32 %v3207_v60, %v3206_v13 }
 0xfe2   :  { %v3209_v0 = vpop.f32.mrf.mxu1 }
 0xfe3   :  { %v2635_v4 = vadd.f32 %v3208_v14, %v4442_v38  ;;  %v3658_v38 = vld [vmem:[#allocation16 + $0x30] ss:$8 sps:$4 sm:$0xff]  }
 0xfe4   :  { %v3210_v5 = vpop.f32.mrf.mxu1  ;;  %2766 = vmatpush1.bf16.msra.mxu0 %v3658_v38 }
 0xfe5   :  { %v3211_v6 = vadd.f32 %v3210_v5, %v3209_v0  ;;  %v2638_v8 = vmul.f32 %v2635_v4, %v2635_v4  ;;  %2767 = vmatprep.subr.bf16.mxu0 %v3663_v28 }
 0xfe7   :  { %v2636_v17 = vadd.f32 %v3211_v6, %v4447_v43  ;;  %2640 = vadd.xlane.f32.xlu0 %v2638_v8  ;;  %v3661_v43 = vld [vmem:[#allocation16 + $0x20] ss:$8 sps:$4 sm:$0xff]  }
 0xfe8   :  { %2768 = vmatpush1.bf16.msra.mxu0 %v3661_v43 }
 0xfe9   :  { %v2639_v18 = vmul.f32 %v2636_v17, %v2636_v17  ;;  %2769 = vmatprep.subr.bf16.mxu0 %v3666_v29 }
 0xfeb   :  { %2642 = vadd.xlane.f32.xlu1 %v2639_v18 }
 0xfec   :  { %2770 = vmatpush1.bf16.msra.mxu0 %v3664_v32 }
 0xfed   :  { %2771 = vmatprep.subr.bf16.mxu0 %v3669_v33 }
 0xff0   :  { %2772 = vmatpush1.bf16.msra.mxu0 %v3667_v34 }
0x1070   :  { %v2641_v35 = vpop.xlane.xlu0 %2640 }
0x1071   :  { %v2644_v36 = vmul.f32 0.0078125, %v2641_v35 }
0x1073   :  { %v2646_v37 = vadd.f32 1e-05, %v2644_v36 }
0x1074   :  { %v2643_v39 = vpop.xlane.xlu1 %2642 }
0x1075   :  { %3734 = vrsqrt.f32 %v2646_v37  ;;  %v2645_v40 = vmul.f32 0.0078125, %v2643_v39 }
0x1077   :  { %v2647_v41 = vadd.f32 1e-05, %v2645_v40 }
0x1079   :  { %3736 = vrsqrt.f32 %v2647_v41 }
0x1082   :  { %v3735_v44 = vpop.eup %3734 }
0x1083   :  { %v2650_v45 = vmul.f32 %v3735_v44, %v2635_v4 }
0x1085   :  { %v2658_v62 = vmul.f32 %v3085_v47, %v2650_v45 }
0x1086   :  { %v3737_v3 = vpop.eup %3736 }
0x1087   :  { %v2651_v61 = vmul.f32 %v3737_v3, %v2636_v17 }
0x1089   :  { %v2659_v42 = vmul.f32 %v3085_v47, %v2651_v61 }
0x108b   :  { %v2676_v1 = vpack.c.bf16 %v2659_v42, %v2658_v62 }
0x108d   :  { %2790 = vmatmul.mubr.bf16.vlgmr.msra.gmra.mxu0 %v2676_v1 }
0x114d   :  { %v2791_v10 = vpop.f32.mrf.mxu0 }
0x114e   :  { %2800 = vst [vmem:[#allocation17] sm:$0xff] %v2791_v10 }
0x114f   :  { %v2793_v9 = vpop.f32.mrf.mxu0 }
0x1150   :  { %2801 = vst [vmem:[#allocation17 + $0x8] sm:$0xff] %v2793_v9 }
0x1151   :  { %v2795_v46 = vpop.f32.mrf.mxu0 }
0x1152   :  { %2802 = vst [vmem:[#allocation17 + $0x10] sm:$0xff] %v2795_v46 }
0x1153   :  { %v2797_v15 = vpop.f32.mrf.mxu0 }
0x1154   :  { %2803 = vst [vmem:[#allocation17 + $0x18] sm:$0xff] %v2797_v15 }
0x1155   :  { %3931 = shalt.err (!%p3928_p7)
}
0x1156   :  { %2815 = dma.vmem_to_hbm [thread:$0]  %s2810_s0, 512, %s4524_s14, [#allocation4], %s3968_s27, %s3968_s27, %s3956_s23  }
0x1157   :  { %3950 = dma.done.wait [#allocation4], 512  }
0x1158   :  { %3951 = vsyncadd [#allocation4], 4294966784 }
0x1159   :  { %2819 = vsyncpa [#allocation3], 1 }
0x115a   :  { %2820 = vsyncpa [#allocation6], 1 }
0x115b   :  { %2821 = vsyncpa [#allocation9], 1 }
0x115c   :  { %2822 = vsyncpa [#allocation12], 1 }
0x115d   :  { %2823 = vsyncpa [#allocation15], 1 }
0x115e   :  { %2824 = vsyncpa [#allocation4], 1 }

</bundles_post_ra>
